<compile_context>
chip_gen: v7x
topology: tpu7x:2x2x1
jax: 0.10.0
libtpu: 0.0.40
codegen_flags: <defaults>
</compile_context>

<pallas_src>
import math
import functools

import jax
import jax.numpy as jnp
from jax.experimental import pallas as pl
from jax.experimental.pallas import tpu as pltpu


# ---------------------------------------------------------------------------
# helpers
# ---------------------------------------------------------------------------
def _round_up(x, m):
    return (x + m - 1) // m * m


def _pad2(a, rows, cols):
    return jnp.pad(a, ((0, rows - a.shape[0]), (0, cols - a.shape[1])))


def _im2col_nhwc(x_nhwc, KH, KW, stride, padding):
    """x: (N, H, W, C) -> patches (N*OH*OW, KH*KW*C), feature order (kh, kw, c)."""
    N, H, W, C = x_nhwc.shape
    xp = jnp.pad(x_nhwc, ((0, 0), (padding, padding), (padding, padding), (0, 0)))
    OH = (H + 2 * padding - KH) // stride + 1
    OW = (W + 2 * padding - KW) // stride + 1
    cols = []
    for kh in range(KH):
        for kw in range(KW):
            cols.append(xp[:, kh:kh + stride * OH:stride,
                              kw:kw + stride * OW:stride, :])
    p = jnp.concatenate(cols, axis=-1)                # (N, OH, OW, KH*KW*C)
    return p.reshape(N * OH * OW, KH * KW * C), OH, OW


# ---------------------------------------------------------------------------
# Pallas kernel 1: conv-as-matmul (+ bias) + per-tile BN partial statistics
# ---------------------------------------------------------------------------
def _conv_bias_stats_kernel(p_ref, w_ref, b_ref, o_ref, stat_ref, *, valid_rows):
    # (TM, CKKp) @ (CKKp, OCp) on the MXU, f32 accumulation, bias add in f32.
    acc = jnp.dot(p_ref[...], w_ref[...], preferred_element_type=jnp.float32)
    y = acc + b_ref[...]
    o_ref[...] = y.astype(o_ref.dtype)

    # Per-channel partial sums over the VALID (un-padded) rows of this tile.
    tm, oc = y.shape
    row0 = pl.program_id(0) * tm
    rows = jax.lax.broadcasted_iota(jnp.int32, (tm, 1), 0) + row0
    m = (rows < valid_rows).astype(jnp.float32)
    ym = y * m
    s = jnp.sum(ym, axis=0, keepdims=True)            # (1, OCp)   sum
    sq = jnp.sum(ym * ym, axis=0, keepdims=True)      # (1, OCp)   sum of squares
    # Pack into an (8, OCp) block (rows 0..3 = sum, rows 4..7 = sumsq) so the
    # stats output keeps the (8, 128)-aligned layout.
    sel = jax.lax.broadcasted_iota(jnp.int32, (8, oc), 0) < 4
    stat_ref[...] = jnp.where(sel, jnp.broadcast_to(s, (8, oc)),
                              jnp.broadcast_to(sq, (8, oc)))


def _conv_im2col_pallas(x_nhwc, w_oihw, b, *, stride, padding, tm=256):
    """Conv2d via im2col + tiled Pallas matmul with fused bias and BN partial stats.

    Returns: y_pad (P_pad, OC_pad) f32, ch_sum (OC,), ch_sumsq (OC,),
             and (OH, OW, P, OC_pad, TM).
    """
    OC, C, KH, KW = w_oihw.shape

    # bf16 MXU inputs (cast BEFORE im2col to halve the expanded-patch HBM traffic)
    patches, OH, OW = _im2col_nhwc(x_nhwc.astype(jnp.bfloat16), KH, KW, stride, padding)
    P, CKK = patches.shape

    CKK_pad = _round_up(CKK, 128)            # MXU contraction dim
    OC_pad = _round_up(OC, 128)              # lane-dense output / full MXU width
    TM = min(tm, _round_up(P, 16))           # multiple of 16 -> bf16-safe sublane tiling
    P_pad = _round_up(P, TM)
    n_tiles = P_pad // TM

    patches_p = _pad2(patches, P_pad, CKK_pad)                       # bf16
    w_flat = jnp.transpose(w_oihw, (2, 3, 1, 0)).reshape(CKK, OC)    # (kh,kw,c) order
    w_p = _pad2(w_flat.astype(jnp.float32), CKK_pad, OC_pad).astype(jnp.bfloat16)
    b_p = jnp.pad(b.astype(jnp.float32), (0, OC_pad - OC)).reshape(1, OC_pad)

    flops = 2 * int(P_pad) * int(CKK_pad) * int(OC_pad)
    bytes_accessed = int(P_pad * CKK_pad * 2 + CKK_pad * OC_pad * 2
                         + OC_pad * 4 + P_pad * OC_pad * 4)

    y_pad, stats = pl.pallas_call(
        functools.partial(_conv_bias_stats_kernel, valid_rows=P),
        out_shape=(jax.ShapeDtypeStruct((P_pad, OC_pad), jnp.float32),
                   jax.ShapeDtypeStruct((n_tiles * 8, OC_pad), jnp.float32)),
        grid_spec=pltpu.PrefetchScalarGridSpec(
            num_scalar_prefetch=0,
            grid=(n_tiles,),
            in_specs=[
                pl.BlockSpec((TM, CKK_pad), lambda i: (i, 0)),       # patches tile
                pl.BlockSpec((CKK_pad, OC_pad), lambda i: (0, 0)),   # weights (resident)
                pl.BlockSpec((1, OC_pad), lambda i: (0, 0)),         # bias (resident)
            ],
            out_specs=[
                pl.BlockSpec((TM, OC_pad), lambda i: (i, 0)),        # conv output tile
                pl.BlockSpec((8, OC_pad), lambda i: (i, 0)),         # per-tile stats
            ],
        ),
        compiler_params=pltpu.CompilerParams(dimension_semantics=("parallel",)),
        cost_estimate=pl.CostEstimate(flops=flops, transcendentals=0,
                                      bytes_accessed=bytes_accessed),
    )(patches_p, w_p, b_p)

    st = stats.reshape(n_tiles, 8, OC_pad)
    ch_sum = st[:, 0, :OC].sum(axis=0)
    ch_sq = st[:, 4, :OC].sum(axis=0)
    return y_pad, ch_sum, ch_sq, (OH, OW, P, OC_pad, TM)


# ---------------------------------------------------------------------------
# BN scale/shift from partial statistics (tiny JAX op)
# ---------------------------------------------------------------------------
def _bn_scale_shift(ch_sum, ch_sq, count, gamma, beta, eps, OC_pad):
    """Training-mode BatchNorm (batch statistics, biased variance like PyTorch)."""
    OC = gamma.shape[0]
    mean = ch_sum / count
    var = jnp.maximum(ch_sq / count - mean * mean, 0.0)
    scale = gamma * jax.lax.rsqrt(var + eps)
    shift = beta - mean * scale
    scale_p = jnp.pad(scale, (0, OC_pad - OC)).reshape(1, OC_pad)   # padded lanes -> 0
    shift_p = jnp.pad(shift, (0, OC_pad - OC)).reshape(1, OC_pad)
    return scale_p, shift_p


# ---------------------------------------------------------------------------
# Pallas kernel 2: fused BN affine + ReLU (bn1 path, bf16 output for conv2)
# ---------------------------------------------------------------------------
def _bn_relu_kernel(y_ref, s_ref, t_ref, o_ref):
    v = y_ref[...] * s_ref[...] + t_ref[...]
    o_ref[...] = jnp.maximum(v, 0.0).astype(o_ref.dtype)


def _pallas_bn_relu(y_pad, scale, shift, *, tm, out_dtype):
    P_pad, OC_pad = y_pad.shape
    return pl.pallas_call(
        _bn_relu_kernel,
        out_shape=jax.ShapeDtypeStruct((P_pad, OC_pad), out_dtype),
        grid_spec=pltpu.PrefetchScalarGridSpec(
            num_scalar_prefetch=0,
            grid=(P_pad // tm,),
            in_specs=[
                pl.BlockSpec((tm, OC_pad), lambda i: (i, 0)),
                pl.BlockSpec((1, OC_pad), lambda i: (0, 0)),
                pl.BlockSpec((1, OC_pad), lambda i: (0, 0)),
            ],
            out_specs=pl.BlockSpec((tm, OC_pad), lambda i: (i, 0)),
        ),
        compiler_params=pltpu.CompilerParams(dimension_semantics=("parallel",)),
    )(y_pad, scale, shift)


# ---------------------------------------------------------------------------
# Pallas kernel 3: fused bn2 affine + shortcut affine + residual add + ReLU
# ---------------------------------------------------------------------------
def _bn_res_relu_kernel(y_ref, s_ref, t_ref, r_ref, rs_ref, rt_ref, o_ref):
    v = (y_ref[...] * s_ref[...] + t_ref[...]
         + r_ref[...] * rs_ref[...] + rt_ref[...])
    o_ref[...] = jnp.maximum(v, 0.0).astype(o_ref.dtype)


def _pallas_bn_res_relu(y_pad, scale, shift, res, res_scale, res_shift, *, tm):
    P_pad, OC_pad = y_pad.shape
    return pl.pallas_call(
        _bn_res_relu_kernel,
        out_shape=jax.ShapeDtypeStruct((P_pad, OC_pad), jnp.float32),
        grid_spec=pltpu.PrefetchScalarGridSpec(
            num_scalar_prefetch=0,
            grid=(P_pad // tm,),
            in_specs=[
                pl.BlockSpec((tm, OC_pad), lambda i: (i, 0)),   # conv2 output tile
                pl.BlockSpec((1, OC_pad), lambda i: (0, 0)),    # bn2 scale
                pl.BlockSpec((1, OC_pad), lambda i: (0, 0)),    # bn2 shift
                pl.BlockSpec((tm, OC_pad), lambda i: (i, 0)),   # residual tile
                pl.BlockSpec((1, OC_pad), lambda i: (0, 0)),    # shortcut-bn scale (or 1)
                pl.BlockSpec((1, OC_pad), lambda i: (0, 0)),    # shortcut-bn shift (or 0)
            ],
            out_specs=pl.BlockSpec((tm, OC_pad), lambda i: (i, 0)),
        ),
        compiler_params=pltpu.CompilerParams(dimension_semantics=("parallel",)),
    )(y_pad, scale, shift, res, res_scale, res_shift)


# ---------------------------------------------------------------------------
# BasicBlockVCL forward
# ---------------------------------------------------------------------------
def _sample_conv_params(p, e, sample_parameters):
    if sample_parameters:
        w = p["posterior_W_means"] + e["w_eps"] * jnp.exp(0.5 * p["posterior_W_log_vars"])
        b = p["posterior_b_means"] + e["b_eps"] * jnp.exp(0.5 * p["posterior_b_log_vars"])
        return w, b
    return p["posterior_W_means"], p["posterior_b_means"]


def basic_block_vcl_forward(x, params, epsilons, *, stride=1,
                            sample_parameters=True, bn_eps=1e-5, tm=256):
    """Forward of BasicBlockVCL.   x: (N, C_in, H, W) NCHW f32 -> (N, planes, OH, OW)."""
    N, Cin, H, W = x.shape
    planes = params["conv1"]["posterior_W_means"].shape[0]

    x_nhwc = jnp.transpose(x, (0, 2, 3, 1))     # single layout change at block entry

    # ---- conv1 -> bn1 -> relu (bf16 intermediate: only feeds the conv2 MXU path) ----
    w1, b1 = _sample_conv_params(params["conv1"], epsilons.get("conv1"), sample_parameters)
    y1, sum1, sq1, (OH1, OW1, P1, OC1p, TM1) = _conv_im2col_pallas(
        x_nhwc, w1, b1, stride=stride, padding=1, tm=tm)
    s1, t1 = _bn_scale_shift(sum1, sq1, P1, params["bn1"]["gamma"],
                             params["bn1"]["beta"], bn_eps, OC1p)
    a1 = _pallas_bn_relu(y1, s1, t1, tm=TM1, out_dtype=jnp.bfloat16)
    out1_nhwc = a1[:P1, :planes].reshape(N, OH1, OW1, planes)

    # ---- conv2 (bn2 affine deferred into the fused final kernel) --------------------
    w2, b2 = _sample_conv_params(params["conv2"], epsilons.get("conv2"), sample_parameters)
    y2, sum2, sq2, (OH2, OW2, P2, OC2p, TM2) = _conv_im2col_pallas(
        out1_nhwc, w2, b2, stride=1, padding=1, tm=tm)
    s2, t2 = _bn_scale_shift(sum2, sq2, P2, params["bn2"]["gamma"],
                             params["bn2"]["beta"], bn_eps, OC2p)

    # ---- shortcut: 1x1 variational conv + bn, or identity; both become (res*rs+rt) --
    if stride != 1 or Cin != planes:
        ws, bs = _sample_conv_params(params["shortcut_conv"],
                                     epsilons.get("shortcut_conv"), sample_parameters)
        ys, sums, sqs, (OHs, OWs, Ps, OCsp, TMs) = _conv_im2col_pallas(
            x_nhwc, ws, bs, stride=stride, padding=0, tm=tm)
        rs, rt = _bn_scale_shift(sums, sqs, Ps, params["bn_s"]["gamma"],
                                 params["bn_s"]["beta"], bn_eps, OCsp)
        res = ys
        if res.shape != y2.shape:   # defensive re-pad (should not trigger)
            res = jnp.pad(res[:Ps, :planes],
                          ((0, y2.shape[0] - Ps), (0, OC2p - planes)))
            rs = jnp.pad(rs[:, :planes], ((0, 0), (0, OC2p - planes)))
            rt = jnp.pad(rt[:, :planes], ((0, 0), (0, OC2p - planes)))
    else:
        xr = x_nhwc.reshape(N * H * W, Cin)
        res = jnp.pad(xr, ((0, y2.shape[0] - xr.shape[0]), (0, OC2p - Cin)))
        rs = jnp.ones((1, OC2p), jnp.float32)
        rt = jnp.zeros((1, OC2p), jnp.float32)

    # ---- bn2 affine + shortcut affine + residual + relu, all in one fused pass ------
    out_pad = _pallas_bn_res_relu(y2, s2, t2, res, rs, rt, tm=TM2)
    out_nhwc = out_pad[:P2, :planes].reshape(N, OH2, OW2, planes)
    return jnp.transpose(out_nhwc, (0, 3, 1, 2))     # back to NCHW (PyTorch layout)


# ---------------------------------------------------------------------------
# Deterministic initialization mirroring the PyTorch module
# ---------------------------------------------------------------------------
def init_block_params(key, in_planes, planes, stride=1, ipv=1e-3):
    def conv_params(k, cin, cout, ksize):
        k1, k2 = jax.random.split(k)
        wshape = (cout, cin, ksize, ksize)
        return {
            "posterior_W_means": 0.1 * jax.random.normal(k1, wshape, jnp.float32),
            "posterior_b_means": jax.random.uniform(k2, (cout,), jnp.float32,
                                                    minval=-0.1, maxval=0.1),
            "posterior_W_log_vars": jnp.full(wshape, math.log(ipv), jnp.float32),
            "posterior_b_log_vars": jnp.full((cout,), math.log(ipv), jnp.float32),
        }
    bn = lambda: {"gamma": jnp.ones((planes,), jnp.float32),
                  "beta": jnp.zeros((planes,), jnp.float32)}
    ks = jax.random.split(key, 3)
    params = {"conv1": conv_params(ks[0], in_planes, planes, 3),
              "conv2": conv_params(ks[1], planes, planes, 3),
              "bn1": bn(), "bn2": bn()}
    if stride != 1 or in_planes != planes:
        params["shortcut_conv"] = conv_params(ks[2], in_planes, planes, 1)
        params["bn_s"] = bn()
    return params


def make_epsilons(key, params):
    names = [n for n in ("conv1", "conv2", "shortcut_conv") if n in params]
    ks = jax.random.split(key, 2 * len(names))
    eps = {}
    for i, name in enumerate(names):
        eps[name] = {
            "w_eps": jax.random.normal(ks[2 * i], params[name]["posterior_W_means"].shape,
                                       jnp.float32),
            "b_eps": jax.random.normal(ks[2 * i + 1], params[name]["posterior_b_means"].shape,
                                       jnp.float32),
        }
    return eps


# ---------------------------------------------------------------------------
# Pure-JAX (XLA) reference for correctness checking
# ---------------------------------------------------------------------------
def _ref_forward(x, params, epsilons, stride, bn_eps=1e-5):
    def conv(xc, w, b, s, pad):
        y = jax.lax.conv_general_dilated(
            xc, w, (s, s), [(pad, pad), (pad, pad)],
            dimension_numbers=("NCHW", "OIHW", "NCHW"))
        return y + b.reshape(1, -1, 1, 1)

    def bn(y, g, bb):
        mean = y.mean(axis=(0, 2, 3), keepdims=True)
        var = y.var(axis=(0, 2, 3), keepdims=True)
        return (y - mean) * jax.lax.rsqrt(var + bn_eps) * g.reshape(1, -1, 1, 1) \
            + bb.reshape(1, -1, 1, 1)

    w1, b1 = _sample_conv_params(params["conv1"], epsilons["conv1"], True)
    w2, b2 = _sample_conv_params(params["conv2"], epsilons["conv2"], True)
    out = jax.nn.relu(bn(conv(x, w1, b1, stride, 1),
                         params["bn1"]["gamma"], params["bn1"]["beta"]))
    out = bn(conv(out, w2, b2, 1, 1), params["bn2"]["gamma"], params["bn2"]["beta"])
    if "shortcut_conv" in params:
        ws, bs = _sample_conv_params(params["shortcut_conv"], epsilons["shortcut_conv"], True)
        sc = bn(conv(x, ws, bs, stride, 0),
                params["bn_s"]["gamma"], params["bn_s"]["beta"])
    else:
        sc = x
    return jax.nn.relu(out + sc)


# ---------------------------------------------------------------------------
if __name__ == "__main__":
    root = jax.random.PRNGKey(0)

    def run_case(key, N, Cin, planes, H, W, stride):
        k_param, k_x, k_eps = jax.random.split(key, 3)
        params = init_block_params(k_param, Cin, planes, stride)
        epsilons = make_epsilons(k_eps, params)
        x = jax.random.normal(k_x, (N, Cin, H, W), jnp.float32)
        fwd = jax.jit(functools.partial(basic_block_vcl_forward,
                                        stride=stride, sample_parameters=True))
        out = jax.block_until_ready(fwd(x, params, epsilons))
        ref = _ref_forward(x, params, epsilons, stride)
        OH = (H + 2 - 3) // stride + 1
        assert out.shape == (N, planes, OH, OH), out.shape
        # bf16 MXU inputs -> loosen tolerance vs. the pure-f32 XLA reference.
        assert jnp.allclose(out, ref, atol=5e-2, rtol=5e-2), \
            f"max abs err {jnp.max(jnp.abs(out - ref))}"

    k1, k2, k3 = jax.random.split(root, 3)
    # (a) in_planes != planes -> variational 1x1 shortcut conv + bn path
    run_case(k1, 2, 4, 8, 16, 16, 1)
    # (b) in_planes == planes, stride 1 -> identity shortcut path
    run_case(k2, 2, 8, 8, 16, 16, 1)
    # (c) stride 2 downsampling with shortcut conv
    run_case(k3, 2, 4, 8, 16, 16, 2)

    print("KERNEL_OK")
</pallas_src>

<mosaic_0001>
module attributes {stable_mosaic.version = 11 : i64} {
  func.func @_conv_bias_stats_kernel(%arg0: i32, %arg1: memref<256x128xbf16, #tpu.memory_space<vmem>>, %arg2: memref<128x128xbf16, #tpu.memory_space<vmem>>, %arg3: memref<1x128xf32, #tpu.memory_space<vmem>>, %arg4: memref<256x128xf32, #tpu.memory_space<vmem>>, %arg5: memref<8x128xf32, #tpu.memory_space<vmem>>) attributes {dimension_semantics = [#tpu.dimension_semantics<parallel>], iteration_bounds = array<i64: 2>, scalar_prefetch = 0 : i64, scratch_operands = 0 : i64, tpu.core_type = #tpu.core_type<tc>, window_params = [{transform_indices = @transform_0, window_bounds = array<i64: 256, 128>}, {pipeline_mode = #tpu.pipeline_mode<synchronous>, transform_indices = @transform_1, window_bounds = array<i64: 128, 128>}, {pipeline_mode = #tpu.pipeline_mode<synchronous>, transform_indices = @transform_2, window_bounds = array<i64: 1, 128>}, {transform_indices = @transform_3, window_bounds = array<i64: 256, 128>}, {transform_indices = @transform_4, window_bounds = array<i64: 8, 128>}]} {
    %c0 = arith.constant 0 : index
    %c0_0 = arith.constant 0 : index
    %0 = vector.load %arg1[%c0, %c0_0] : memref<256x128xbf16, #tpu.memory_space<vmem>>, vector<256x128xbf16>
    %c0_1 = arith.constant 0 : index
    %c0_2 = arith.constant 0 : index
    %1 = vector.load %arg2[%c0_1, %c0_2] : memref<128x128xbf16, #tpu.memory_space<vmem>>, vector<128x128xbf16>
    %cst = arith.constant dense<0.000000e+00> : vector<256x128xf32>
    %2 = tpu.matmul %0, %1, %cst {dimension_numbers = #tpu.dot_dimension_numbers<[1], [0], [0], [1], [0, 0, 1, 1], [], []>} : vector<256x128xbf16>, vector<128x128xbf16>, vector<256x128xf32> -> vector<256x128xf32>
    %c0_3 = arith.constant 0 : index
    %c0_4 = arith.constant 0 : index
    %3 = vector.load %arg3[%c0_3, %c0_4] : memref<1x128xf32, #tpu.memory_space<vmem>>, vector<1x128xf32>
    %4 = vector.broadcast %3 : vector<1x128xf32> to vector<256x128xf32>
    %5 = arith.addf %2, %4 : vector<256x128xf32>
    %c0_5 = arith.constant 0 : index
    %c0_6 = arith.constant 0 : index
    %6 = vector.load %arg4[%c0_5, %c0_6] : memref<256x128xf32, #tpu.memory_space<vmem>>, vector<256x128xf32>
    tpu.vector_store %arg4[%c0_5, %c0_6], %5 {strides = array<i32>} : memref<256x128xf32, #tpu.memory_space<vmem>>, vector<256x128xf32>,
    %c256_i32 = arith.constant 256 : i32
    %7 = arith.muli %arg0, %c256_i32 : i32
    %8 = tpu.iota {dimensions = array<i32: 0>} : vector<256x1xi32>
    %9 = vector.broadcast %7 : i32 to vector<256x1xi32>
    %10 = arith.addi %8, %9 : vector<256x1xi32>
    %c512_i32 = arith.constant 512 : i32
    %11 = vector.broadcast %c512_i32 : i32 to vector<256x1xi32>
    %12 = arith.cmpi slt, %10, %11 : vector<256x1xi32>
    %13 = arith.extui %12 : vector<256x1xi1> to vector<256x1xi32>
    %14 = arith.sitofp %13 : vector<256x1xi32> to vector<256x1xf32>
    %15 = vector.broadcast %14 : vector<256x1xf32> to vector<256x128xf32>
    %16 = arith.mulf %5, %15 : vector<256x128xf32>
    %cst_7 = arith.constant dense<0.000000e+00> : vector<128xf32>
    %17 = vector.multi_reduction <add>, %16, %cst_7 [0] : vector<256x128xf32> to vector<128xf32>
    %18 = vector.shape_cast %17 : vector<128xf32> to vector<1x128xf32>
    %19 = arith.mulf %16, %16 : vector<256x128xf32>
    %cst_8 = arith.constant dense<0.000000e+00> : vector<128xf32>
    %20 = vector.multi_reduction <add>, %19, %cst_8 [0] : vector<256x128xf32> to vector<128xf32>
    %21 = vector.shape_cast %20 : vector<128xf32> to vector<1x128xf32>
    %22 = tpu.iota {dimensions = array<i32: 0>} : vector<8x128xi32>
    %c4_i32 = arith.constant 4 : i32
    %23 = vector.broadcast %c4_i32 : i32 to vector<8x128xi32>
    %24 = arith.cmpi slt, %22, %23 : vector<8x128xi32>
    %25 = vector.shape_cast %18 : vector<1x128xf32> to vector<1x128xf32>
    %26 = vector.broadcast %25 : vector<1x128xf32> to vector<8x128xf32>
    %27 = vector.shape_cast %21 : vector<1x128xf32> to vector<1x128xf32>
    %28 = vector.broadcast %27 : vector<1x128xf32> to vector<8x128xf32>
    %29 = arith.select %24, %26, %28 : vector<8x128xi1>, vector<8x128xf32>
    %c0_9 = arith.constant 0 : index
    %c0_10 = arith.constant 0 : index
    %30 = vector.load %arg5[%c0_9, %c0_10] : memref<8x128xf32, #tpu.memory_space<vmem>>, vector<8x128xf32>
    tpu.vector_store %arg5[%c0_9, %c0_10], %29 {strides = array<i32>} : memref<8x128xf32, #tpu.memory_space<vmem>>, vector<8x128xf32>,
    return
  }
  func.func @transform_0(%arg0: i32) -> (i32, i32) {
    %c0_i32 = arith.constant 0 : i32
    %c0_i32_0 = arith.constant 0 : i32
    return %arg0, %c0_i32 : i32, i32
  }
  func.func @transform_1(%arg0: i32) -> (i32, i32) {
    %c0_i32 = arith.constant 0 : i32
    %c0_i32_0 = arith.constant 0 : i32
    %c0_i32_1 = arith.constant 0 : i32
    return %c0_i32, %c0_i32_0 : i32, i32
  }
  func.func @transform_2(%arg0: i32) -> (i32, i32) {
    %c0_i32 = arith.constant 0 : i32
    %c0_i32_0 = arith.constant 0 : i32
    %c0_i32_1 = arith.constant 0 : i32
    return %c0_i32, %c0_i32_0 : i32, i32
  }
  func.func @transform_3(%arg0: i32) -> (i32, i32) {
    %c0_i32 = arith.constant 0 : i32
    %c0_i32_0 = arith.constant 0 : i32
    return %arg0, %c0_i32 : i32, i32
  }
  func.func @transform_4(%arg0: i32) -> (i32, i32) {
    %c0_i32 = arith.constant 0 : i32
    %c0_i32_0 = arith.constant 0 : i32
    return %arg0, %c0_i32 : i32, i32
  }
}

module attributes {stable_mosaic.version = 11 : i64} {
  func.func @_bn_relu_kernel(%arg0: i32, %arg1: memref<256x128xf32, #tpu.memory_space<vmem>>, %arg2: memref<1x128xf32, #tpu.memory_space<vmem>>, %arg3: memref<1x128xf32, #tpu.memory_space<vmem>>, %arg4: memref<256x128xbf16, #tpu.memory_space<vmem>>) attributes {dimension_semantics = [#tpu.dimension_semantics<parallel>], iteration_bounds = array<i64: 2>, scalar_prefetch = 0 : i64, scratch_operands = 0 : i64, tpu.core_type = #tpu.core_type<tc>, window_params = [{transform_indices = @transform_0, window_bounds = array<i64: 256, 128>}, {pipeline_mode = #tpu.pipeline_mode<synchronous>, transform_indices = @transform_1, window_bounds = array<i64: 1, 128>}, {pipeline_mode = #tpu.pipeline_mode<synchronous>, transform_indices = @transform_2, window_bounds = array<i64: 1, 128>}, {transform_indices = @transform_3, window_bounds = array<i64: 256, 128>}]} {
    %c0 = arith.constant 0 : index
    %c0_0 = arith.constant 0 : index
    %0 = vector.load %arg1[%c0, %c0_0] : memref<256x128xf32, #tpu.memory_space<vmem>>, vector<256x128xf32>
    %c0_1 = arith.constant 0 : index
    %c0_2 = arith.constant 0 : index
    %1 = vector.load %arg2[%c0_1, %c0_2] : memref<1x128xf32, #tpu.memory_space<vmem>>, vector<1x128xf32>
    %2 = vector.broadcast %1 : vector<1x128xf32> to vector<256x128xf32>
    %3 = arith.mulf %0, %2 : vector<256x128xf32>
    %c0_3 = arith.constant 0 : index
    %c0_4 = arith.constant 0 : index
    %4 = vector.load %arg3[%c0_3, %c0_4] : memref<1x128xf32, #tpu.memory_space<vmem>>, vector<1x128xf32>
    %5 = vector.broadcast %4 : vector<1x128xf32> to vector<256x128xf32>
    %6 = arith.addf %3, %5 : vector<256x128xf32>
    %cst = arith.constant 0.000000e+00 : f32
    %7 = vector.broadcast %cst : f32 to vector<256x128xf32>
    %8 = arith.maximumf %6, %7 : vector<256x128xf32>
    %9 = arith.truncf %8 : vector<256x128xf32> to vector<256x128xbf16>
    %c0_5 = arith.constant 0 : index
    %c0_6 = arith.constant 0 : index
    %10 = vector.load %arg4[%c0_5, %c0_6] : memref<256x128xbf16, #tpu.memory_space<vmem>>, vector<256x128xbf16>
    tpu.vector_store %arg4[%c0_5, %c0_6], %9 {strides = array<i32>} : memref<256x128xbf16, #tpu.memory_space<vmem>>, vector<256x128xbf16>,
    return
  }
  func.func @transform_0(%arg0: i32) -> (i32, i32) {
    %c0_i32 = arith.constant 0 : i32
    %c0_i32_0 = arith.constant 0 : i32
    return %arg0, %c0_i32 : i32, i32
  }
  func.func @transform_1(%arg0: i32) -> (i32, i32) {
    %c0_i32 = arith.constant 0 : i32
    %c0_i32_0 = arith.constant 0 : i32
    %c0_i32_1 = arith.constant 0 : i32
    return %c0_i32, %c0_i32_0 : i32, i32
  }
  func.func @transform_2(%arg0: i32) -> (i32, i32) {
    %c0_i32 = arith.constant 0 : i32
    %c0_i32_0 = arith.constant 0 : i32
    %c0_i32_1 = arith.constant 0 : i32
    return %c0_i32, %c0_i32_0 : i32, i32
  }
  func.func @transform_3(%arg0: i32) -> (i32, i32) {
    %c0_i32 = arith.constant 0 : i32
    %c0_i32_0 = arith.constant 0 : i32
    return %arg0, %c0_i32 : i32, i32
  }
}

module attributes {stable_mosaic.version = 11 : i64} {
  func.func @_bn_res_relu_kernel(%arg0: i32, %arg1: memref<256x128xf32, #tpu.memory_space<vmem>>, %arg2: memref<1x128xf32, #tpu.memory_space<vmem>>, %arg3: memref<1x128xf32, #tpu.memory_space<vmem>>, %arg4: memref<256x128xf32, #tpu.memory_space<vmem>>, %arg5: memref<1x128xf32, #tpu.memory_space<vmem>>, %arg6: memref<1x128xf32, #tpu.memory_space<vmem>>, %arg7: memref<256x128xf32, #tpu.memory_space<vmem>>) attributes {dimension_semantics = [#tpu.dimension_semantics<parallel>], iteration_bounds = array<i64: 2>, scalar_prefetch = 0 : i64, scratch_operands = 0 : i64, tpu.core_type = #tpu.core_type<tc>, window_params = [{transform_indices = @transform_0, window_bounds = array<i64: 256, 128>}, {pipeline_mode = #tpu.pipeline_mode<synchronous>, transform_indices = @transform_1, window_bounds = array<i64: 1, 128>}, {pipeline_mode = #tpu.pipeline_mode<synchronous>, transform_indices = @transform_2, window_bounds = array<i64: 1, 128>}, {transform_indices = @transform_3, window_bounds = array<i64: 256, 128>}, {pipeline_mode = #tpu.pipeline_mode<synchronous>, transform_indices = @transform_4, window_bounds = array<i64: 1, 128>}, {pipeline_mode = #tpu.pipeline_mode<synchronous>, transform_indices = @transform_5, window_bounds = array<i64: 1, 128>}, {transform_indices = @transform_6, window_bounds = array<i64: 256, 128>}]} {
    %c0 = arith.constant 0 : index
    %c0_0 = arith.constant 0 : index
    %0 = vector.load %arg1[%c0, %c0_0] : memref<256x128xf32, #tpu.memory_space<vmem>>, vector<256x128xf32>
    %c0_1 = arith.constant 0 : index
    %c0_2 = arith.constant 0 : index
    %1 = vector.load %arg2[%c0_1, %c0_2] : memref<1x128xf32, #tpu.memory_space<vmem>>, vector<1x128xf32>
    %2 = vector.broadcast %1 : vector<1x128xf32> to vector<256x128xf32>
    %3 = arith.mulf %0, %2 : vector<256x128xf32>
    %c0_3 = arith.constant 0 : index
    %c0_4 = arith.constant 0 : index
    %4 = vector.load %arg3[%c0_3, %c0_4] : memref<1x128xf32, #tpu.memory_space<vmem>>, vector<1x128xf32>
    %5 = vector.broadcast %4 : vector<1x128xf32> to vector<256x128xf32>
    %6 = arith.addf %3, %5 : vector<256x128xf32>
    %c0_5 = arith.constant 0 : index
    %c0_6 = arith.constant 0 : index
    %7 = vector.load %arg4[%c0_5, %c0_6] : memref<256x128xf32, #tpu.memory_space<vmem>>, vector<256x128xf32>
    %c0_7 = arith.constant 0 : index
    %c0_8 = arith.constant 0 : index
    %8 = vector.load %arg5[%c0_7, %c0_8] : memref<1x128xf32, #tpu.memory_space<vmem>>, vector<1x128xf32>
    %9 = vector.broadcast %8 : vector<1x128xf32> to vector<256x128xf32>
    %10 = arith.mulf %7, %9 : vector<256x128xf32>
    %11 = arith.addf %6, %10 : vector<256x128xf32>
    %c0_9 = arith.constant 0 : index
    %c0_10 = arith.constant 0 : index
    %12 = vector.load %arg6[%c0_9, %c0_10] : memref<1x128xf32, #tpu.memory_space<vmem>>, vector<1x128xf32>
    %13 = vector.broadcast %12 : vector<1x128xf32> to vector<256x128xf32>
    %14 = arith.addf %11, %13 : vector<256x128xf32>
    %cst = arith.constant 0.000000e+00 : f32
    %15 = vector.broadcast %cst : f32 to vector<256x128xf32>
    %16 = arith.maximumf %14, %15 : vector<256x128xf32>
    %c0_11 = arith.constant 0 : index
    %c0_12 = arith.constant 0 : index
    %17 = vector.load %arg7[%c0_11, %c0_12] : memref<256x128xf32, #tpu.memory_space<vmem>>, vector<256x128xf32>
    tpu.vector_store %arg7[%c0_11, %c0_12], %16 {strides = array<i32>} : memref<256x128xf32, #tpu.memory_space<vmem>>, vector<256x128xf32>,
    return
  }
  func.func @transform_0(%arg0: i32) -> (i32, i32) {
    %c0_i32 = arith.constant 0 : i32
    %c0_i32_0 = arith.constant 0 : i32
    return %arg0, %c0_i32 : i32, i32
  }
  func.func @transform_1(%arg0: i32) -> (i32, i32) {
    %c0_i32 = arith.constant 0 : i32
    %c0_i32_0 = arith.constant 0 : i32
    %c0_i32_1 = arith.constant 0 : i32
    return %c0_i32, %c0_i32_0 : i32, i32
  }
  func.func @transform_2(%arg0: i32) -> (i32, i32) {
    %c0_i32 = arith.constant 0 : i32
    %c0_i32_0 = arith.constant 0 : i32
    %c0_i32_1 = arith.constant 0 : i32
    return %c0_i32, %c0_i32_0 : i32, i32
  }
  func.func @transform_3(%arg0: i32) -> (i32, i32) {
    %c0_i32 = arith.constant 0 : i32
    %c0_i32_0 = arith.constant 0 : i32
    return %arg0, %c0_i32 : i32, i32
  }
  func.func @transform_4(%arg0: i32) -> (i32, i32) {
    %c0_i32 = arith.constant 0 : i32
    %c0_i32_0 = arith.constant 0 : i32
    %c0_i32_1 = arith.constant 0 : i32
    return %c0_i32, %c0_i32_0 : i32, i32
  }
  func.func @transform_5(%arg0: i32) -> (i32, i32) {
    %c0_i32 = arith.constant 0 : i32
    %c0_i32_0 = arith.constant 0 : i32
    %c0_i32_1 = arith.constant 0 : i32
    return %c0_i32, %c0_i32_0 : i32, i32
  }
  func.func @transform_6(%arg0: i32) -> (i32, i32) {
    %c0_i32 = arith.constant 0 : i32
    %c0_i32_0 = arith.constant 0 : i32
    return %arg0, %c0_i32 : i32, i32
  }
}

</mosaic_0001>

<bundles_post_ra>
// kernel: basic_block_vcl_forward.6
= control target key start
LH: loop header
LB: loop body
LE: loop exit
PB: predicated region body
PF: predicated region fallthrough
CT: control target
= control target key end

     0   :  { %s740_s12 = smov 0   ;;  %s887_s0 = inlined_call_operand.vmem [shape: f32[512,128], index: 0, kind: input, shape index: {}]   ;;  %s888_s1 = inlined_call_operand.vmem [shape: f32[1,128], index: 1, kind: input, shape index: {}]   ;;  %s889_s2 = inlined_call_operand.vmem [shape: f32[1,128], index: 2, kind: input, shape index: {}]   ;;  %s890_s3 = inlined_call_operand.vmem [shape: bf16[512,128], index: 3, kind: output, shape index: {}]  }
   0x1 LB: > { %s532_s13 = sadd.s32 4294967295, %s718_s12   ;;  %p536_p0 = scmp.ge.s32.totalorder %s718_s12, 1  ;;  %s718_s12 = sphi %s740_s12, %s13_s12  }
   0x2   : > { %p138_p1 = scmp.lt.s32.totalorder %s718_s12, 3 }
   0x4   : > { %p139_p2 = pnand %p536_p0, %p138_p1 }
   0x5   : > { %s537_s14 = sshll.u32 (!%p139_p2), %s532_s13, 5  ;;  %v754_v0 = vld [vmem:[%s888_s1] ss:$0 sm:$0xff] (!%p139_p2) }
   0x6   : > { %142 = sbr.rel (%p139_p2) target bundleno = 51 (0x33), region = 32  ;;  %p163_p3 = scmp.lt.s32.totalorder (!%p139_p2), %s537_s14, 63  ;;  %v764_v1 = vld [vmem:[%s889_s2] ss:$0 sm:$0xff] (!%p139_p2) }
   0xd   : > { %s892_s14 = smov (!%p163_p3, %s537_s14), 63 }
   0xe   : > { %s538_s15 = sshll.u32 %s892_s14, 3  ;;  %s540_s23 = sshll.u32 %s892_s14, 2 }
   0xf   : > { %s759_s20 = scalar_lea.vmem %s887_s0, %s538_s15  ;;  %s796_s26 = scalar_lea.vmem %s890_s3, %s540_s23 }
  0x10   : > { %v174_v2 = vld [vmem:[%s759_s20] sm:$0xff]  ;;  %v175_v3 = vld [vmem:[%s759_s20 + $0x8] sm:$0xff]  ;;  %v176_v4 = vld [vmem:[%s759_s20 + $0x10] sm:$0xff] }
  0x11   : > { %v213_v5 = vmul.f32 %v754_v0, %v174_v2  ;;  %v214_v6 = vmul.f32 %v754_v0, %v175_v3  ;;  %v177_v7 = vld [vmem:[%s759_s20 + $0x18] sm:$0xff]  ;;  %v215_v8 = vmul.f32 %v754_v0, %v176_v4  ;;  %v178_v9 = vld [vmem:[%s759_s20 + $0x20] sm:$0xff]  ;;  %v179_v10 = vld [vmem:[%s759_s20 + $0x28] sm:$0xff] }
  0x12   : > { %v216_v11 = vmul.f32 %v754_v0, %v177_v7  ;;  %v217_v12 = vmul.f32 %v754_v0, %v178_v9  ;;  %v218_v13 = vmul.f32 %v754_v0, %v179_v10  ;;  %v180_v14 = vld [vmem:[%s759_s20 + $0x30] sm:$0xff]  ;;  %v181_v15 = vld [vmem:[%s759_s20 + $0x38] sm:$0xff]  ;;  %v182_v24 = vld [vmem:[%s759_s20 + $0x40] sm:$0xff] }
  0x13   : > { %v252_v16 = vadd.f32 %v764_v1, %v213_v5  ;;  %v253_v17 = vadd.f32 %v764_v1, %v214_v6  ;;  %v254_v18 = vadd.f32 %v764_v1, %v215_v8  ;;  %v219_v19 = vmul.f32 %v754_v0, %v180_v14  ;;  %v183_v25 = vld [vmem:[%s759_s20 + $0x48] sm:$0xff]  ;;  %v184_v30 = vld [vmem:[%s759_s20 + $0x50] sm:$0xff]  ;;  %v185_v35 = vld [vmem:[%s759_s20 + $0x58] sm:$0xff] }
  0x14   : > { %v255_v20 = vadd.f32 %v764_v1, %v216_v11  ;;  %v256_v21 = vadd.f32 %v764_v1, %v217_v12  ;;  %v257_v22 = vadd.f32 %v764_v1, %v218_v13  ;;  %v220_v23 = vmul.f32 %v754_v0, %v181_v15  ;;  %v186_v36 = vld [vmem:[%s759_s20 + $0x60] sm:$0xff]  ;;  %v187_v41 = vld [vmem:[%s759_s20 + $0x68] sm:$0xff]  ;;  %v188_v42 = vld [vmem:[%s759_s20 + $0x70] sm:$0xff] }
  0x15   : > { %v284_v26 = vmax.f32 %v252_v16, 0.0  ;;  %v285_v27 = vmax.f32 %v253_v17, 0.0  ;;  %v286_v28 = vmax.f32 %v254_v18, 0.0  ;;  %v258_v29 = vadd.f32 %v764_v1, %v219_v19  ;;  %v189_v51 = vld [vmem:[%s759_s20 + $0x78] sm:$0xff]  ;;  %v190_v56 = vld [vmem:[%s759_s20 + $0x80] sm:$0xff]  ;;  %v191_v61 = vld [vmem:[%s759_s20 + $0x88] sm:$0xff] }
  0x16   : > { %v287_v31 = vmax.f32 %v255_v20, 0.0  ;;  %v288_v32 = vmax.f32 %v256_v21, 0.0  ;;  %v289_v33 = vmax.f32 %v257_v22, 0.0  ;;  %v259_v34 = vadd.f32 %v764_v1, %v220_v23  ;;  %v192_v4 = vld [vmem:[%s759_s20 + $0x90] sm:$0xff]  ;;  %v193_v5 = vld [vmem:[%s759_s20 + $0x98] sm:$0xff]  ;;  %v194_v10 = vld [vmem:[%s759_s20 + $0xa0] sm:$0xff] }
  0x17   : > { %v612_v37 = vpack.c.bf16 %v285_v27, %v284_v26  ;;  %v290_v38 = vmax.f32 %v258_v29, 0.0  ;;  %v221_v39 = vmul.f32 %v754_v0, %v182_v24  ;;  %v222_v40 = vmul.f32 %v754_v0, %v183_v25  ;;  %v195_v15 = vld [vmem:[%s759_s20 + $0xa8] sm:$0xff]  ;;  %v196_v20 = vld [vmem:[%s759_s20 + $0xb0] sm:$0xff]  ;;  %v197_v25 = vld [vmem:[%s759_s20 + $0xb8] sm:$0xff] }
  0x18   : > { %v617_v43 = vpack.c.bf16 %v287_v31, %v286_v28  ;;  %v622_v44 = vpack.c.bf16 %v289_v33, %v288_v32  ;;  %v291_v45 = vmax.f32 %v259_v34, 0.0  ;;  %v223_v46 = vmul.f32 %v754_v0, %v184_v30  ;;  %v198_v30 = vld [vmem:[%s759_s20 + $0xc0] sm:$0xff] }
  0x19   : > { %613 = vst [vmem:[%s796_s26] sm:$0xff] %v612_v37   ;;  %v260_v47 = vadd.f32 %v764_v1, %v221_v39  ;;  %v261_v48 = vadd.f32 %v764_v1, %v222_v40  ;;  %v224_v49 = vmul.f32 %v754_v0, %v185_v35  ;;  %v225_v50 = vmul.f32 %v754_v0, %v186_v36  ;;  %v199_v35 = vld [vmem:[%s759_s20 + $0xc8] sm:$0xff]  ;;  %v200_v40 = vld [vmem:[%s759_s20 + $0xd0] sm:$0xff] }
  0x1a   : > { %689 = vst [vmem:[%s796_s26 + $0x8] sm:$0xff] %v617_v43   ;;  %690 = vst [vmem:[%s796_s26 + $0x10] sm:$0xff] %v622_v44   ;;  %v627_v52 = vpack.c.bf16 %v291_v45, %v290_v38  ;;  %v262_v53 = vadd.f32 %v764_v1, %v223_v46  ;;  %v226_v54 = vmul.f32 %v754_v0, %v187_v41  ;;  %v201_v41 = vld [vmem:[%s759_s20 + $0xd8] sm:$0xff]  ;;  %v202_v46 = vld [vmem:[%s759_s20 + $0xe0] sm:$0xff] }
  0x1b   : > { %v227_v55 = vmul.f32 %v754_v0, %v188_v42  ;;  %v292_v57 = vmax.f32 %v260_v47, 0.0  ;;  %v293_v58 = vmax.f32 %v261_v48, 0.0  ;;  %v263_v59 = vadd.f32 %v764_v1, %v224_v49 }
  0x1c   : > { %v264_v60 = vadd.f32 %v764_v1, %v225_v50  ;;  %691 = vst [vmem:[%s796_s26 + $0x18] sm:$0xff] %v627_v52   ;;  %v294_v62 = vmax.f32 %v262_v53, 0.0  ;;  %v265_v63 = vadd.f32 %v764_v1, %v226_v54  ;;  %v228_v2 = vmul.f32 %v754_v0, %v189_v51  ;;  %v203_v51 = vld [vmem:[%s759_s20 + $0xe8] sm:$0xff] }
  0x1d   : > { %v266_v3 = vadd.f32 %v764_v1, %v227_v55  ;;  %v632_v6 = vpack.c.bf16 %v293_v58, %v292_v57  ;;  %v295_v7 = vmax.f32 %v263_v59, 0.0  ;;  %v229_v9 = vmul.f32 %v754_v0, %v190_v56  ;;  %v204_v56 = vld [vmem:[%s759_s20 + $0xf0] sm:$0xff] }
  0x1e   : > { %v296_v8 = vmax.f32 %v264_v60, 0.0  ;;  %v297_v11 = vmax.f32 %v265_v63, 0.0  ;;  %v267_v12 = vadd.f32 %v764_v1, %v228_v2  ;;  %v230_v14 = vmul.f32 %v754_v0, %v191_v61  ;;  %v205_v61 = vld [vmem:[%s759_s20 + $0xf8] sm:$0xff] }
  0x1f   : > { %v298_v13 = vmax.f32 %v266_v3, 0.0  ;;  %692 = vst [vmem:[%s796_s26 + $0x20] sm:$0xff] %v632_v6   ;;  %v637_v16 = vpack.c.bf16 %v295_v7, %v294_v62  ;;  %v268_v17 = vadd.f32 %v764_v1, %v229_v9  ;;  %v231_v18 = vmul.f32 %v754_v0, %v192_v4 }
  0x20   : > { %v232_v19 = vmul.f32 %v754_v0, %v193_v5  ;;  %v642_v21 = vpack.c.bf16 %v297_v11, %v296_v8  ;;  %v299_v22 = vmax.f32 %v267_v12, 0.0  ;;  %v269_v23 = vadd.f32 %v764_v1, %v230_v14 }
  0x21   : > { %v233_v24 = vmul.f32 %v754_v0, %v194_v10  ;;  %693 = vst [vmem:[%s796_s26 + $0x28] sm:$0xff] %v637_v16   ;;  %v300_v26 = vmax.f32 %v268_v17, 0.0  ;;  %v270_v27 = vadd.f32 %v764_v1, %v231_v18  ;;  %v234_v29 = vmul.f32 %v754_v0, %v195_v15 }
  0x22   : > { %v271_v28 = vadd.f32 %v764_v1, %v232_v19  ;;  %694 = vst [vmem:[%s796_s26 + $0x30] sm:$0xff] %v642_v21   ;;  %v647_v31 = vpack.c.bf16 %v299_v22, %v298_v13  ;;  %v301_v32 = vmax.f32 %v269_v23, 0.0  ;;  %v235_v34 = vmul.f32 %v754_v0, %v196_v20 }
  0x23   : > { %v272_v33 = vadd.f32 %v764_v1, %v233_v24  ;;  %v302_v36 = vmax.f32 %v270_v27, 0.0  ;;  %v273_v38 = vadd.f32 %v764_v1, %v234_v29  ;;  %v236_v39 = vmul.f32 %v754_v0, %v197_v25 }
  0x24   : > { %v303_v37 = vmax.f32 %v271_v28, 0.0  ;;  %695 = vst [vmem:[%s796_s26 + $0x38] sm:$0xff] %v647_v31   ;;  %v652_v42 = vpack.c.bf16 %v301_v32, %v300_v26  ;;  %v274_v44 = vadd.f32 %v764_v1, %v235_v34  ;;  %v237_v45 = vmul.f32 %v754_v0, %v198_v30 }
  0x25   : > { %v304_v43 = vmax.f32 %v272_v33, 0.0  ;;  %v305_v48 = vmax.f32 %v273_v38, 0.0  ;;  %v275_v49 = vadd.f32 %v764_v1, %v236_v39  ;;  %v238_v50 = vmul.f32 %v754_v0, %v199_v35 }
  0x26   : > { %v657_v47 = vpack.c.bf16 %v303_v37, %v302_v36  ;;  %696 = vst [vmem:[%s796_s26 + $0x40] sm:$0xff] %v652_v42   ;;  %v306_v52 = vmax.f32 %v274_v44, 0.0  ;;  %v276_v53 = vadd.f32 %v764_v1, %v237_v45  ;;  %v239_v54 = vmul.f32 %v754_v0, %v200_v40 }
  0x27   : > { %v240_v55 = vmul.f32 %v754_v0, %v201_v41  ;;  %v662_v57 = vpack.c.bf16 %v305_v48, %v304_v43  ;;  %v307_v58 = vmax.f32 %v275_v49, 0.0  ;;  %v277_v59 = vadd.f32 %v764_v1, %v238_v50 }
  0x28   : > { %697 = vst [vmem:[%s796_s26 + $0x48] sm:$0xff] %v657_v47   ;;  %v241_v60 = vmul.f32 %v754_v0, %v202_v46  ;;  %v308_v62 = vmax.f32 %v276_v53, 0.0  ;;  %v278_v63 = vadd.f32 %v764_v1, %v239_v54  ;;  %v242_v3 = vmul.f32 %v754_v0, %v203_v51 }
  0x29   : > { %v279_v2 = vadd.f32 %v764_v1, %v240_v55  ;;  %698 = vst [vmem:[%s796_s26 + $0x50] sm:$0xff] %v662_v57   ;;  %v667_v4 = vpack.c.bf16 %v307_v58, %v306_v52  ;;  %v309_v5 = vmax.f32 %v277_v59, 0.0  ;;  %v243_v7 = vmul.f32 %v754_v0, %v204_v56 }
  0x2a   : > { %v280_v6 = vadd.f32 %v764_v1, %v241_v60  ;;  %v310_v8 = vmax.f32 %v278_v63, 0.0  ;;  %v281_v10 = vadd.f32 %v764_v1, %v242_v3  ;;  %v244_v11 = vmul.f32 %v754_v0, %v205_v61 }
  0x2b   : > { %v311_v9 = vmax.f32 %v279_v2, 0.0  ;;  %699 = vst [vmem:[%s796_s26 + $0x58] sm:$0xff] %v667_v4   ;;  %v672_v12 = vpack.c.bf16 %v309_v5, %v308_v62  ;;  %v282_v14 = vadd.f32 %v764_v1, %v243_v7 }
  0x2c   : > { %v312_v13 = vmax.f32 %v280_v6, 0.0  ;;  %v313_v16 = vmax.f32 %v281_v10, 0.0  ;;  %v283_v17 = vadd.f32 %v764_v1, %v244_v11 }
  0x2d   : > { %v677_v15 = vpack.c.bf16 %v311_v9, %v310_v8  ;;  %700 = vst [vmem:[%s796_s26 + $0x60] sm:$0xff] %v672_v12   ;;  %v314_v18 = vmax.f32 %v282_v14, 0.0 }
  0x2e   : > { %v682_v19 = vpack.c.bf16 %v313_v16, %v312_v13  ;;  %v315_v20 = vmax.f32 %v283_v17, 0.0 }
  0x2f   : > { %701 = vst [vmem:[%s796_s26 + $0x68] sm:$0xff] %v677_v15  }
  0x30   : > { %702 = vst [vmem:[%s796_s26 + $0x70] sm:$0xff] %v682_v19   ;;  %v687_v21 = vpack.c.bf16 %v315_v20, %v314_v18 }
  0x32   : > { %703 = vst [vmem:[%s796_s26 + $0x78] sm:$0xff] %v687_v21  }
  0x33 PF: > { %s13_s12 = sadd.s32 1, %s718_s12  }
  0x34   : > { %p10_p4 = scmp.ge.s32.totalorder %s13_s12, 4  }
  0x36   :  { %12 = sbr.rel (!%p10_p4) target bundleno = 1 (0x1), region = 62 }

// kernel: basic_block_vcl_forward.5
= control target key start
LH: loop header
LB: loop body
LE: loop exit
PB: predicated region body
PF: predicated region fallthrough
CT: control target
= control target key end

     0   :  { %s1221_s15 = smov 0   ;;  %s1593_s0 = inlined_call_operand.vmem [shape: bf16[512,128], index: 0, kind: input, shape index: {}]   ;;  %s1594_s1 = inlined_call_operand.vmem [shape: bf16[128,128], index: 1, kind: input, shape index: {}]   ;;  %s1595_s2 = inlined_call_operand.vmem [shape: f32[1,128], index: 2, kind: input, shape index: {}]   ;;  %s1596_s3 = inlined_call_operand.vmem [shape: f32[512,128], index: 3, kind: output, shape index: {0}]   ;;  %s1597_s4 = inlined_call_operand.vmem [shape: f32[16,128], index: 4, kind: output, shape index: {1}]  }
   0x1 LB: > { %s1227_s16 = sadd.s32 4294967295, %s1193_s15   ;;  %p1000_p0 = scmp.ge.s32.totalorder %s1193_s15, 1  ;;  %s1193_s15 = sphi %s1221_s15, %s15_s15  }
   0x2   : > { %p166_p1 = scmp.lt.s32.totalorder %s1193_s15, 3 }
   0x4   : > { %p167_p2 = pnand %p1000_p0, %p166_p1 }
   0x5   : > { %v1163_v0 = vld [vmem:[%s1594_s1] sm:$0xff] (!%p167_p2)   ;;  %s1001_s19 = sshll.u32 (!%p167_p2), %s1227_s16, 5  ;;  %v1164_v1 = vld [vmem:[%s1594_s1 + $0x8] sm:$0xff] (!%p167_p2)   ;;  %v1165_v2 = vld [vmem:[%s1594_s1 + $0x10] sm:$0xff] (!%p167_p2)   ;;  %v606_v24 = vlaneseq (!%p167_p2)  ;;  %s1031_s12 = sshll.u32 (!%p167_p2), %s1227_s16, 8  ;;  %v1195_v50 = vmov (!%p167_p2), 0.0  }
   0x6   : > { %170 = sbr.rel (%p167_p2) target bundleno = 336 (0x150), region = 32  ;;  %p197_p3 = scmp.lt.s32.totalorder (!%p167_p2), %s1001_s19, 63  ;;  %1090 = vmatprep.subr.bf16.mxu0 (!%p167_p2), %v1163_v0  ;;  %1138 = vmatprep.subr.bf16.mxu1 (!%p167_p2), %v1163_v0  ;;  %v1166_v3 = vld [vmem:[%s1594_s1 + $0x18] sm:$0xff] (!%p167_p2)   ;;  %v1167_v5 = vld [vmem:[%s1594_s1 + $0x20] sm:$0xff] (!%p167_p2)   ;;  %v1168_v6 = vld [vmem:[%s1594_s1 + $0x28] sm:$0xff] (!%p167_p2)   ;;  %v1284_v27 = vstv (!%p167_p2), %s1031_s12 }
   0x7   : > { %1091 = vmatpush3.bf16.msra.mxu0 (!%p167_p2), %v1163_v0  ;;  %1146 = vmatpush3.bf16.msra.mxu1 (!%p167_p2), %v1163_v0  ;;  %v1169_v8 = vld [vmem:[%s1594_s1 + $0x30] sm:$0xff] (!%p167_p2)   ;;  %v1170_v9 = vld [vmem:[%s1594_s1 + $0x38] sm:$0xff] (!%p167_p2)   ;;  %v1280_v25 = vshrl.u32 (!%p167_p2), %v606_v24, 7  ;;  %v1312_v49 = vld [vmem:[%s1595_s2] ss:$0 sm:$0xff] (!%p167_p2)  ;;  %p208_p4 = scmp.lt.s32.totalorder (!%p167_p2), %s1227_s16, 1 }
   0x8   : > { %1092 = vmatprep.subr.bf16.mxu0 (!%p167_p2), %v1164_v1  ;;  %1139 = vmatprep.subr.bf16.mxu1 (!%p167_p2), %v1164_v1 }
   0x9   : > { %v609_v26 = vadd.s32 (!%p167_p2), 16, %v1280_v25  ;;  %v610_v28 = vadd.s32 (!%p167_p2), 24, %v1280_v25  ;;  %v608_v29 = vadd.s32 (!%p167_p2), 8, %v1280_v25  ;;  %v613_v30 = vadd.s32 (!%p167_p2), 48, %v1280_v25 }
   0xa   : > { %v611_v31 = vadd.s32 (!%p167_p2), 32, %v1280_v25  ;;  %v640_v33 = vadd.s32 (!%p167_p2), %v1284_v27, %v1280_v25  ;;  %v614_v37 = vadd.s32 (!%p167_p2), 56, %v1280_v25  ;;  %v612_v38 = vadd.s32 (!%p167_p2), 40, %v1280_v25 }
   0xb   : > { %1093 = vmatpush3.bf16.msra.mxu0 (!%p167_p2), %v1164_v1  ;;  %1147 = vmatpush3.bf16.msra.mxu1 (!%p167_p2), %v1164_v1  ;;  %v642_v32 = vadd.s32 (!%p167_p2), %v1284_v27, %v609_v26  ;;  %v643_v34 = vadd.s32 (!%p167_p2), %v1284_v27, %v610_v28  ;;  %v641_v35 = vadd.s32 (!%p167_p2), %v1284_v27, %v608_v29  ;;  %v617_v40 = vadd.s32 (!%p167_p2), 80, %v1280_v25 }
   0xc   : > { %1094 = vmatprep.subr.bf16.mxu0 (!%p167_p2), %v1165_v2  ;;  %1140 = vmatprep.subr.bf16.mxu1 (!%p167_p2), %v1165_v2  ;;  %v646_v36 = vadd.s32 (!%p167_p2), %v1284_v27, %v613_v30  ;;  %v644_v39 = vadd.s32 (!%p167_p2), %v1284_v27, %v611_v31  ;;  %v615_v41 = vadd.s32 (!%p167_p2), 64, %v1280_v25  ;;  %v618_v42 = vadd.s32 (!%p167_p2), 88, %v1280_v25 }
   0xd   : > { %s1599_s19 = smov (!%p197_p3, %s1001_s19), 63  ;;  %vm674_vm0 = vcmp.lt.s32.totalorder %v642_v32, 512  ;;  %v616_v43 = vadd.s32 72, %v1280_v25  ;;  %vm672_vm1 = vcmp.lt.s32.totalorder %v640_v33, 512  ;;  %vm675_vm2 = vcmp.lt.s32.totalorder %v643_v34, 512  ;;  %s1601_s16 = smov (!%p208_p4, %s1227_s16), 1 }
   0xe   : > { %s1002_s24 = sshll.u32 %s1599_s19, 2  ;;  %vm673_vm3 = vcmp.lt.s32.totalorder %v641_v35, 512  ;;  %vm678_vm4 = vcmp.lt.s32.totalorder %v646_v36, 512  ;;  %v647_v44 = vadd.s32 %v1284_v27, %v614_v37  ;;  %v645_v45 = vadd.s32 %v1284_v27, %v612_v38  ;;  %s1004_s13 = sshll.u32 %s1599_s19, 3 }
   0xf   : > { %s1247_s27 = scalar_lea.vmem %s1593_s0, %s1002_s24  ;;  %1095 = vmatpush3.bf16.msra.mxu0 %v1165_v2  ;;  %1148 = vmatpush3.bf16.msra.mxu1 %v1165_v2  ;;  %v621_v46 = vadd.s32 112, %v1280_v25  ;;  %vm676_vm5 = vcmp.lt.s32.totalorder %v644_v39, 512  ;;  %v650_v47 = vadd.s32 %v1284_v27, %v617_v40  ;;  %v648_v48 = vadd.s32 %v1284_v27, %v615_v41  ;;  %s1331_s20 = scalar_lea.vmem %s1596_s3, %s1004_s13 }
  0x10   : > { %v1171_v4 = vld [vmem:[%s1247_s27] sm:$0xff]   ;;  %1096 = vmatprep.subr.bf16.mxu0 %v1166_v3  ;;  %1141 = vmatprep.subr.bf16.mxu1 %v1166_v3  ;;  %v1172_v10 = vld [vmem:[%s1247_s27 + $0x8] sm:$0xff]   ;;  %v1173_v12 = vld [vmem:[%s1247_s27 + $0x10] sm:$0xff]   ;;  %v1034_v51 = vsel %vm674_vm0, 1.0, %v1195_v50  ;;  %v1032_v52 = vsel %vm672_vm1, 1.0, %v1195_v50  ;;  %v651_v53 = vadd.s32 %v1284_v27, %v618_v42  ;;  %v649_v54 = vadd.s32 %v1284_v27, %v616_v43  ;;  %s1005_s21 = sshll.u32 %s1601_s16, 3 }
  0x11   : > { %1106 = vmatprep.mubr.bf16.mxu0 %v1171_v4  ;;  %v1179_v7 = vld [vmem:[%s1247_s27 + $0x40] sm:$0xff]   ;;  %v1180_v11 = vld [vmem:[%s1247_s27 + $0x48] sm:$0xff]   ;;  %v1181_v13 = vld [vmem:[%s1247_s27 + $0x50] sm:$0xff]   ;;  %v1035_v55 = vsel %vm675_vm2, 1.0, %v1195_v50  ;;  %v1033_v56 = vsel %vm673_vm3, 1.0, %v1195_v50  ;;  %v1325_v57 = vsel %vm678_vm4, 1.0, %v1195_v50  ;;  %v654_v61 = vadd.s32 %v1284_v27, %v621_v46  ;;  %s211_s24 = scalar_lea.vmem %s1597_s4, %s1005_s21 }
  0x12   : > { %1122 = vmatprep.mubr.bf16.mxu1 %v1179_v7  ;;  %v1174_v14 = vld [vmem:[%s1247_s27 + $0x18] sm:$0xff]   ;;  %v1175_v16 = vld [vmem:[%s1247_s27 + $0x20] sm:$0xff]   ;;  %v1176_v18 = vld [vmem:[%s1247_s27 + $0x28] sm:$0xff]   ;;  %v619_v58 = vadd.s32 96, %v1280_v25  ;;  %v1334_v60 = vsel %vm676_vm5, 1.0, %v1195_v50  ;;  %vm679_vm6 = vcmp.lt.s32.totalorder %v647_v44, 512 }
  0x13   : > { %1097 = vmatpush3.bf16.msra.mxu0 %v1166_v3  ;;  %1149 = vmatpush3.bf16.msra.mxu1 %v1166_v3  ;;  %v1182_v15 = vld [vmem:[%s1247_s27 + $0x58] sm:$0xff]   ;;  %v1183_v17 = vld [vmem:[%s1247_s27 + $0x60] sm:$0xff]   ;;  %v1184_v19 = vld [vmem:[%s1247_s27 + $0x68] sm:$0xff]   ;;  %vm677_vm7 = vcmp.lt.s32.totalorder %v645_v45, 512  ;;  %vm682_vm8 = vcmp.lt.s32.totalorder %v650_v47, 512  ;;  %vm680_vm9 = vcmp.lt.s32.totalorder %v648_v48, 512 }
  0x14   : > { %1098 = vmatprep.subr.bf16.mxu0 %v1167_v5  ;;  %1142 = vmatprep.subr.bf16.mxu1 %v1167_v5  ;;  %v1177_v20 = vld [vmem:[%s1247_s27 + $0x30] sm:$0xff]   ;;  %v1178_v22 = vld [vmem:[%s1247_s27 + $0x38] sm:$0xff]   ;;  %vm683_vm10 = vcmp.lt.s32.totalorder %v651_v53, 512  ;;  %vm681_vm11 = vcmp.lt.s32.totalorder %v649_v54, 512  ;;  %vm686_vm12 = vcmp.lt.s32.totalorder %v654_v61, 512 }
  0x15   : > { %v1185_v21 = vld [vmem:[%s1247_s27 + $0x70] sm:$0xff]   ;;  %v1186_v23 = vld [vmem:[%s1247_s27 + $0x78] sm:$0xff]   ;;  %v1386_v26 = vsel %vm681_vm11, 1.0, %v1195_v50  ;;  %v1390_v28 = vsel %vm686_vm12, 1.0, %v1195_v50 }
  0x17   : > { %1099 = vmatpush3.bf16.msra.mxu0 %v1167_v5  ;;  %1150 = vmatpush3.bf16.msra.mxu1 %v1167_v5 }
  0x18   : > { %1100 = vmatprep.subr.bf16.mxu0 %v1168_v6  ;;  %1143 = vmatprep.subr.bf16.mxu1 %v1168_v6 }
  0x1b   : > { %1101 = vmatpush3.bf16.msra.mxu0 %v1168_v6  ;;  %1151 = vmatpush3.bf16.msra.mxu1 %v1168_v6 }
  0x1c   : > { %1102 = vmatprep.subr.bf16.mxu0 %v1169_v8  ;;  %1144 = vmatprep.subr.bf16.mxu1 %v1169_v8 }
  0x1f   : > { %1103 = vmatpush3.bf16.msra.mxu0 %v1169_v8  ;;  %1152 = vmatpush3.bf16.msra.mxu1 %v1169_v8 }
  0x20   : > { %1104 = vmatprep.subr.bf16.mxu0 %v1170_v9  ;;  %1145 = vmatprep.subr.bf16.mxu1 %v1170_v9 }
  0x23   : > { %1105 = vmatpush3.bf16.msra.mxu0 %v1170_v9  ;;  %1153 = vmatpush3.bf16.msra.mxu1 %v1170_v9  ;;  %v652_v9 = vadd.s32 %v1284_v27, %v619_v58 }
  0x25   : > { %vm684_vm13 = vcmp.lt.s32.totalorder %v652_v9, 512 }
  0x26   : > { %1107 = vmatmul.mubr.bf16.vlgmr.msra.gmra.mrb[0].mxu0 %v1172_v10  ;;  %1123 = vmatmul.mubr.bf16.vlgmr.msra.gmra.mrb[0].mxu1 %v1180_v11  ;;  %v622_v10 = vadd.s32 120, %v1280_v25 }
  0x27   : > { %1110 = vmatprep.mubr.bf16.mxu0 %v1173_v12  ;;  %1126 = vmatprep.mubr.bf16.mxu1 %v1181_v13 }
  0x28   : > { %v1393_v29 = vadd.s32 %v1284_v27, %v622_v10 }
  0x2a   : > { %vm687_vm14 = vcmp.lt.s32.totalorder %v1393_v29, 512 }
  0x2e   : > { %1111 = vmatmul.mubr.bf16.gmra.mrb[4].mxu0 %v1174_v14  ;;  %1127 = vmatmul.mubr.bf16.gmra.mrb[4].mxu1 %v1182_v15 }
  0x2f   : > { %1114 = vmatprep.mubr.bf16.mxu0 %v1175_v16  ;;  %1130 = vmatprep.mubr.bf16.mxu1 %v1183_v17  ;;  %v1039_v17 = vsel %vm679_vm6, 1.0, %v1195_v50 }
  0x36   : > { %1115 = vmatmul.mubr.bf16.gmra.mrb[8].mxu0 %v1176_v18  ;;  %1131 = vmatmul.mubr.bf16.gmra.mrb[8].mxu1 %v1184_v19  ;;  %v1037_v18 = vsel %vm677_vm7, 1.0, %v1195_v50  ;;  %v620_v19 = vadd.s32 104, %v1280_v25 }
  0x37   : > { %1118 = vmatprep.mubr.bf16.mxu0 %v1177_v20  ;;  %1134 = vmatprep.mubr.bf16.mxu1 %v1185_v21  ;;  %v1372_v21 = vsel %vm682_vm8, 1.0, %v1195_v50 }
  0x38   : > { %v1397_v38 = vadd.s32 %v1284_v27, %v620_v19 }
  0x3a   : > { %vm685_vm15 = vcmp.lt.s32.totalorder %v1397_v38, 512 }
  0x3e   : > { %1119 = vmatmul.mubr.bf16.gmra.mrb[12].mxu0 %v1178_v22  ;;  %1135 = vmatmul.mubr.bf16.gmra.mrb[12].mxu1 %v1186_v23  ;;  %v1376_v22 = vsel %vm680_vm9, 1.0, %v1195_v50  ;;  %v1380_v23 = vsel %vm683_vm10, 1.0, %v1195_v50 }
  0xf9   : > { %v1108_v59 = vpop.f32.mrb[0].mxu0  ;;  %v1124_v62 = vpop.f32.mrb[0].mxu1 }
  0xfa   : > { %v455_v63 = vadd.f32 %v1108_v59, %v1312_v49  ;;  %v446_v0 = vpop.f32.mrb[1].mxu0  ;;  %v1339_v1 = vadd.f32 %v1124_v62, %v1312_v49  ;;  %v510_v2 = vpop.f32.mrb[1].mxu1  ;;  %v625_v62 = vadd.s32 144, %v1280_v25 }
  0xfb   : > { %v447_v3 = vadd.f32 %v1312_v49, %v446_v0  ;;  %v1109_v4 = vpop.f32.mrb[2].mxu0  ;;  %v1343_v5 = vadd.f32 %v1312_v49, %v510_v2  ;;  %v1125_v6 = vpop.f32.mrb[2].mxu1 }
  0xfc   : > { %575 = vst [vmem:[%s1331_s20 + $0x10] sm:$0xff] %v455_v63  ;;  %v458_v7 = vadd.f32 %v1109_v4, %v1312_v49  ;;  %v449_v8 = vpop.f32.mrb[3].mxu0  ;;  %591 = vst [vmem:[%s1331_s20 + $0x90] sm:$0xff] %v1339_v1  ;;  %v1352_v11 = vadd.f32 %v1125_v6, %v1312_v49  ;;  %v513_v12 = vpop.f32.mrb[3].mxu1  ;;  %v770_v16 = vmul.f32 %v1034_v51, %v455_v63  ;;  %v623_v4 = vadd.s32 128, %v1280_v25 }
  0xfd   : > { %573 = vst [vmem:[%s1331_s20] sm:$0xff] %v447_v3  ;;  %v768_v13 = vmul.f32 %v1032_v52, %v447_v3  ;;  %v450_v14 = vadd.f32 %v1312_v49, %v449_v8  ;;  %589 = vst [vmem:[%s1331_s20 + $0x80] sm:$0xff] %v1343_v5  ;;  %v1359_v15 = vadd.f32 %v1312_v49, %v513_v12  ;;  %v1410_v52 = vsel %vm684_vm13, 1.0, %v1195_v50 }
  0xfe   : > { %576 = vst [vmem:[%s1331_s20 + $0x18] sm:$0xff] %v458_v7  ;;  %592 = vst [vmem:[%s1331_s20 + $0x98] sm:$0xff] %v1352_v11  ;;  %v771_v24 = vmul.f32 %v1035_v55, %v458_v7  ;;  %v839_v35 = vmul.f32 %v770_v16, %v770_v16  ;;  %v624_v12 = vadd.s32 136, %v1280_v25 }
  0xff   : > { %574 = vst [vmem:[%s1331_s20 + $0x8] sm:$0xff] %v450_v14  ;;  %v769_v20 = vmul.f32 %v1033_v56, %v450_v14  ;;  %590 = vst [vmem:[%s1331_s20 + $0x88] sm:$0xff] %v1359_v15  ;;  %v837_v30 = vmul.f32 %v768_v13, %v768_v13 }
 0x100   : > { %v840_v47 = vmul.f32 %v771_v24, %v771_v24 }
 0x101   : > { %v800_v31 = vadd.f32 %v769_v20, %v768_v13  ;;  %v838_v32 = vmul.f32 %v769_v20, %v769_v20  ;;  %v1112_v33 = vpop.f32.mrb[4].mxu0  ;;  %v1128_v34 = vpop.f32.mrb[4].mxu1 }
 0x102   : > { %v471_v36 = vadd.f32 %v1112_v33, %v1312_v49  ;;  %v462_v37 = vpop.f32.mrb[5].mxu0  ;;  %v1400_v39 = vadd.f32 %v1128_v34, %v1312_v49  ;;  %v526_v40 = vpop.f32.mrb[5].mxu1 }
 0x103   : > { %v801_v41 = vadd.f32 %v800_v31, %v770_v16  ;;  %v869_v42 = vadd.f32 %v838_v32, %v837_v30  ;;  %v463_v43 = vadd.f32 %v1312_v49, %v462_v37  ;;  %v1113_v44 = vpop.f32.mrb[6].mxu0  ;;  %v1404_v45 = vadd.f32 %v1312_v49, %v526_v40  ;;  %v1129_v46 = vpop.f32.mrb[6].mxu1 }
 0x104   : > { %579 = vst [vmem:[%s1331_s20 + $0x30] sm:$0xff] %v471_v36  ;;  %v474_v48 = vadd.f32 %v1113_v44, %v1312_v49  ;;  %v465_v51 = vpop.f32.mrb[7].mxu0  ;;  %595 = vst [vmem:[%s1331_s20 + $0xb0] sm:$0xff] %v1400_v39  ;;  %v1415_v53 = vadd.f32 %v1129_v46, %v1312_v49  ;;  %v529_v54 = vpop.f32.mrb[7].mxu1  ;;  %v774_v61 = vmul.f32 %v1325_v57, %v471_v36  ;;  %v626_v57 = vadd.s32 152, %v1280_v25 }
 0x105   : > { %v870_v55 = vadd.f32 %v869_v42, %v839_v35  ;;  %577 = vst [vmem:[%s1331_s20 + $0x20] sm:$0xff] %v463_v43  ;;  %v772_v56 = vmul.f32 %v1334_v60, %v463_v43  ;;  %v802_v58 = vadd.f32 %v801_v41, %v771_v24  ;;  %v466_v59 = vadd.f32 %v1312_v49, %v465_v51 }
 0x106   : > { %593 = vst [vmem:[%s1331_s20 + $0xa0] sm:$0xff] %v1404_v45  ;;  %580 = vst [vmem:[%s1331_s20 + $0x38] sm:$0xff] %v474_v48  ;;  %v775_v3 = vmul.f32 %v1039_v17, %v474_v48  ;;  %v1433_v6 = vadd.f32 %v1312_v49, %v529_v54  ;;  %v843_v14 = vmul.f32 %v774_v61, %v774_v61  ;;  %v1047_v51 = vsel %vm687_vm14, 1.0, %v1195_v50 }
 0x107   : > { %596 = vst [vmem:[%s1331_s20 + $0xb8] sm:$0xff] %v1415_v53  ;;  %v803_v63 = vadd.f32 %v802_v58, %v772_v56  ;;  %v841_v0 = vmul.f32 %v772_v56, %v772_v56  ;;  %v871_v2 = vadd.f32 %v870_v55, %v840_v47  ;;  %578 = vst [vmem:[%s1331_s20 + $0x28] sm:$0xff] %v466_v59  ;;  %v1045_v54 = vsel %vm685_vm15, 1.0, %v1195_v50 }
 0x108   : > { %v773_v60 = vmul.f32 %v1037_v18, %v466_v59  ;;  %v1438_v17 = vadd.s32 %v1284_v27, %v625_v62  ;;  %594 = vst [vmem:[%s1331_s20 + $0xa8] sm:$0xff] %v1433_v6  ;;  %v844_v35 = vmul.f32 %v775_v3, %v775_v3  ;;  %v656_v40 = vadd.s32 %v1284_v27, %v623_v4 }
 0x109   : > { %v872_v7 = vadd.f32 %v871_v2, %v841_v0  ;;  %v1116_v10 = vpop.f32.mrb[8].mxu0  ;;  %v1132_v13 = vpop.f32.mrb[8].mxu1  ;;  %v1453_v41 = vadd.s32 %v1284_v27, %v626_v57  ;;  %v1471_v55 = vadd.s32 %v1284_v27, %v624_v12 }
 0x10a   : > { %v804_v8 = vadd.f32 %v803_v63, %v773_v60  ;;  %v842_v9 = vmul.f32 %v773_v60, %v773_v60  ;;  %v487_v16 = vadd.f32 %v1116_v10, %v1312_v49  ;;  %v478_v18 = vpop.f32.mrb[9].mxu0  ;;  %v1443_v19 = vadd.f32 %v1132_v13, %v1312_v49  ;;  %v542_v20 = vpop.f32.mrb[9].mxu1 }
 0x10b   : > { %v479_v31 = vadd.f32 %v1312_v49, %v478_v18  ;;  %v1117_v32 = vpop.f32.mrb[10].mxu0  ;;  %v1447_v33 = vadd.f32 %v1312_v49, %v542_v20  ;;  %v1133_v34 = vpop.f32.mrb[10].mxu1  ;;  %vm688_vm0 = vcmp.lt.s32.totalorder %v656_v40, 512  ;;  %vm690_vm1 = vcmp.lt.s32.totalorder %v1438_v17, 512 }
 0x10c   : > { %v805_v24 = vadd.f32 %v804_v8, %v774_v61  ;;  %v873_v30 = vadd.f32 %v872_v7, %v842_v9  ;;  %583 = vst [vmem:[%s1331_s20 + $0x50] sm:$0xff] %v487_v16  ;;  %v490_v36 = vadd.f32 %v1117_v32, %v1312_v49  ;;  %v481_v37 = vpop.f32.mrb[11].mxu0  ;;  %599 = vst [vmem:[%s1331_s20 + $0xd0] sm:$0xff] %v1443_v19  ;;  %v545_v42 = vpop.f32.mrb[11].mxu1  ;;  %vm691_vm2 = vcmp.lt.s32.totalorder %v1453_v41, 512 }
 0x10d   : > { %581 = vst [vmem:[%s1331_s20 + $0x40] sm:$0xff] %v479_v31  ;;  %v776_v44 = vmul.f32 %v1376_v22, %v479_v31  ;;  %v482_v47 = vadd.f32 %v1312_v49, %v481_v37  ;;  %597 = vst [vmem:[%s1331_s20 + $0xc0] sm:$0xff] %v1447_v33  ;;  %v778_v48 = vmul.f32 %v1372_v21, %v487_v16  ;;  %v1048_v20 = vsel %vm688_vm0, 1.0, %v1195_v50 }
 0x10e   : > { %v874_v43 = vadd.f32 %v873_v30, %v843_v14  ;;  %v806_v46 = vadd.f32 %v805_v24, %v775_v3  ;;  %584 = vst [vmem:[%s1331_s20 + $0x58] sm:$0xff] %v490_v36  ;;  %v779_v21 = vmul.f32 %v1380_v23, %v490_v36  ;;  %v1477_v29 = vadd.f32 %v1133_v34, %v1312_v49 }
 0x10f   : > { %v845_v56 = vmul.f32 %v776_v44, %v776_v44  ;;  %582 = vst [vmem:[%s1331_s20 + $0x48] sm:$0xff] %v482_v47  ;;  %v777_v59 = vmul.f32 %v1386_v26, %v482_v47  ;;  %v1480_v38 = vadd.f32 %v1312_v49, %v545_v42  ;;  %v847_v2 = vmul.f32 %v778_v48, %v778_v48 }
 0x110   : > { %v807_v22 = vadd.f32 %v806_v46, %v776_v44  ;;  %v875_v58 = vadd.f32 %v874_v43, %v844_v35  ;;  %v627_v3 = vadd.s32 160, %v1280_v25  ;;  %600 = vst [vmem:[%s1331_s20 + $0xd8] sm:$0xff] %v1477_v29  ;;  %v848_v14 = vmul.f32 %v779_v21, %v779_v21 }
 0x111   : > { %v846_v63 = vmul.f32 %v777_v59, %v777_v59  ;;  %v1120_v0 = vpop.f32.mrb[12].mxu0  ;;  %v1136_v26 = vpop.f32.mrb[12].mxu1  ;;  %598 = vst [vmem:[%s1331_s20 + $0xc8] sm:$0xff] %v1480_v38  ;;  %vm689_vm3 = vcmp.lt.s32.totalorder %v1471_v55, 512  ;;  %v629_v36 = vadd.s32 176, %v1280_v25  ;;  %v628_v40 = vadd.s32 168, %v1280_v25 }
 0x112   : > { %v876_v61 = vadd.f32 %v875_v58, %v845_v56  ;;  %v808_v62 = vadd.f32 %v807_v22, %v777_v59  ;;  %v503_v23 = vadd.f32 %v1120_v0, %v1312_v49  ;;  %v494_v60 = vpop.f32.mrb[13].mxu0  ;;  %v1491_v4 = vadd.f32 %v1136_v26, %v1312_v49  ;;  %v558_v57 = vpop.f32.mrb[13].mxu1 }
 0x113   : > { %v495_v9 = vadd.f32 %v1312_v49, %v494_v60  ;;  %v1121_v10 = vpop.f32.mrb[14].mxu0  ;;  %v1495_v12 = vadd.f32 %v1312_v49, %v558_v57  ;;  %v1137_v13 = vpop.f32.mrb[14].mxu1  ;;  %v660_v37 = vadd.s32 %v1284_v27, %v627_v3  ;;  %v784_v47 = vmul.f32 %v1048_v20, %v1343_v5 }
 0x114   : > { %v809_v7 = vadd.f32 %v808_v62, %v778_v48  ;;  %v877_v8 = vadd.f32 %v876_v61, %v846_v63  ;;  %587 = vst [vmem:[%s1331_s20 + $0x70] sm:$0xff] %v503_v23  ;;  %v506_v16 = vadd.f32 %v1121_v10, %v1312_v49  ;;  %v497_v18 = vpop.f32.mrb[15].mxu0  ;;  %603 = vst [vmem:[%s1331_s20 + $0xf0] sm:$0xff] %v1491_v4  ;;  %v561_v24 = vpop.f32.mrb[15].mxu1  ;;  %v630_v48 = vadd.s32 184, %v1280_v25 }
 0x115   : > { %585 = vst [vmem:[%s1331_s20 + $0x60] sm:$0xff] %v495_v9  ;;  %v780_v31 = vmul.f32 %v1410_v52, %v495_v9  ;;  %v498_v34 = vadd.f32 %v1312_v49, %v497_v18  ;;  %601 = vst [vmem:[%s1331_s20 + $0xe0] sm:$0xff] %v1495_v12  ;;  %v782_v35 = vmul.f32 %v1390_v28, %v503_v23  ;;  %vm692_vm4 = vcmp.lt.s32.totalorder %v660_v37, 512 }
 0x116   : > { %v878_v30 = vadd.f32 %v877_v8, %v847_v2  ;;  %v810_v32 = vadd.f32 %v809_v7, %v779_v21  ;;  %588 = vst [vmem:[%s1331_s20 + $0x78] sm:$0xff] %v506_v16  ;;  %v783_v46 = vmul.f32 %v1047_v51, %v506_v16  ;;  %v1518_v28 = vadd.f32 %v1137_v13, %v1312_v49 }
 0x117   : > { %v849_v43 = vmul.f32 %v780_v31, %v780_v31  ;;  %586 = vst [vmem:[%s1331_s20 + $0x68] sm:$0xff] %v498_v34  ;;  %v781_v52 = vmul.f32 %v1045_v54, %v498_v34  ;;  %v1521_v59 = vadd.f32 %v1312_v49, %v561_v24  ;;  %v1049_v21 = vsel %vm689_vm3, 1.0, %v1195_v50 }
 0x118   : > { %v811_v42 = vadd.f32 %v810_v32, %v780_v31  ;;  %v879_v44 = vadd.f32 %v878_v30, %v848_v14  ;;  %v662_v51 = vadd.s32 %v1284_v27, %v629_v36  ;;  %v661_v5 = vadd.s32 %v1284_v27, %v628_v40  ;;  %604 = vst [vmem:[%s1331_s20 + $0xf8] sm:$0xff] %v1518_v28 }
 0x119   : > { %v850_v58 = vmul.f32 %v781_v52, %v781_v52  ;;  %v631_v54 = vadd.s32 192, %v1280_v25  ;;  %v851_v61 = vmul.f32 %v782_v35, %v782_v35  ;;  %602 = vst [vmem:[%s1331_s20 + $0xe8] sm:$0xff] %v1521_v59  ;;  %v1050_v49 = vsel %vm690_vm1, 1.0, %v1195_v50 }
 0x11a   : > { %v880_v22 = vadd.f32 %v879_v44, %v849_v43  ;;  %v812_v56 = vadd.f32 %v811_v42, %v781_v52  ;;  %v853_v55 = vmul.f32 %v784_v47, %v784_v47  ;;  %v1051_v0 = vsel %vm691_vm2, 1.0, %v1195_v50 }
 0x11b   : > { %v663_v26 = vadd.s32 %v1284_v27, %v630_v48  ;;  %v852_v2 = vmul.f32 %v783_v46, %v783_v46  ;;  %v785_v3 = vmul.f32 %v1049_v21, %v1359_v15  ;;  %vm694_vm5 = vcmp.lt.s32.totalorder %v662_v51, 512 }
 0x11c   : > { %v813_v62 = vadd.f32 %v812_v56, %v782_v35  ;;  %v881_v63 = vadd.f32 %v880_v22, %v850_v58  ;;  %v1052_v57 = vsel %vm692_vm4, 1.0, %v1195_v50  ;;  %v664_v7 = vadd.s32 %v1284_v27, %v631_v54 }
 0x11d   : > { %v632_v17 = vadd.s32 200, %v1280_v25  ;;  %v786_v8 = vmul.f32 %v1050_v49, %v1339_v1  ;;  %vm693_vm6 = vcmp.lt.s32.totalorder %v661_v5, 512  ;;  %v787_v41 = vmul.f32 %v1051_v0, %v1352_v11 }
 0x11e   : > { %v882_v23 = vadd.f32 %v881_v63, %v851_v61  ;;  %v814_v60 = vadd.f32 %v813_v62, %v783_v46  ;;  %vm695_vm7 = vcmp.lt.s32.totalorder %v663_v26, 512  ;;  %v633_v13 = vadd.s32 208, %v1280_v25 }
 0x11f   : > { %v634_v14 = vadd.s32 216, %v1280_v25  ;;  %v854_v18 = vmul.f32 %v785_v3, %v785_v3  ;;  %v788_v20 = vmul.f32 %v1052_v57, %v1404_v45  ;;  %v1054_v24 = vsel %vm694_vm5, 1.0, %v1195_v50 }
 0x120   : > { %v815_v9 = vadd.f32 %v814_v60, %v784_v47  ;;  %v883_v10 = vadd.f32 %v882_v23, %v852_v2  ;;  %v1053_v1 = vsel %vm693_vm6, 1.0, %v1195_v50  ;;  %vm696_vm8 = vcmp.lt.s32.totalorder %v664_v7, 512 }
 0x121   : > { %v665_v30 = vadd.s32 %v1284_v27, %v632_v17  ;;  %v855_v31 = vmul.f32 %v786_v8, %v786_v8  ;;  %v635_v34 = vadd.s32 224, %v1280_v25  ;;  %v856_v35 = vmul.f32 %v787_v41, %v787_v41 }
 0x122   : > { %v884_v15 = vadd.f32 %v883_v10, %v853_v55  ;;  %v816_v16 = vadd.f32 %v815_v9, %v785_v3  ;;  %v1055_v36 = vsel %vm695_vm7, 1.0, %v1195_v50  ;;  %v666_v37 = vadd.s32 %v1284_v27, %v633_v13 }
 0x123   : > { %v667_v45 = vadd.s32 %v1284_v27, %v634_v14  ;;  %v857_v43 = vmul.f32 %v788_v20, %v788_v20  ;;  %v789_v44 = vmul.f32 %v1053_v1, %v1433_v6  ;;  %v1056_v52 = vsel %vm696_vm8, 1.0, %v1195_v50 }
 0x124   : > { %v817_v11 = vadd.f32 %v816_v16, %v786_v8  ;;  %v885_v32 = vadd.f32 %v884_v15, %v854_v18  ;;  %vm697_vm9 = vcmp.lt.s32.totalorder %v665_v30, 512  ;;  %v636_v46 = vadd.s32 232, %v1280_v25 }
 0x125   : > { %v790_v47 = vmul.f32 %v1054_v24, %v1400_v39  ;;  %v668_v56 = vadd.s32 %v1284_v27, %v635_v34  ;;  %v791_v58 = vmul.f32 %v1055_v36, %v1415_v53  ;;  %vm698_vm10 = vcmp.lt.s32.totalorder %v666_v37, 512 }
 0x126   : > { %v886_v40 = vadd.f32 %v885_v32, %v855_v31  ;;  %v818_v42 = vadd.f32 %v817_v11, %v787_v41  ;;  %vm699_vm11 = vcmp.lt.s32.totalorder %v667_v45, 512  ;;  %v637_v21 = vadd.s32 240, %v1280_v25 }
 0x127   : > { %v858_v6 = vmul.f32 %v789_v44, %v789_v44  ;;  %v792_v54 = vmul.f32 %v1056_v52, %v1447_v33  ;;  %v1057_v61 = vsel %vm697_vm9, 1.0, %v1195_v50  ;;  %v638_v62 = vadd.s32 248, %v1280_v25 }
 0x128   : > { %v819_v48 = vadd.f32 %v818_v42, %v788_v20  ;;  %v887_v22 = vadd.f32 %v886_v40, %v856_v35  ;;  %v669_v39 = vadd.s32 %v1284_v27, %v636_v46  ;;  %v859_v63 = vmul.f32 %v790_v47, %v790_v47 }
 0x129   : > { %vm700_vm12 = vcmp.lt.s32.totalorder %v668_v56, 512  ;;  %v860_v53 = vmul.f32 %v791_v58, %v791_v58  ;;  %v1058_v0 = vsel %vm698_vm10, 1.0, %v1195_v50  ;;  %v1059_v26 = vsel %vm699_vm11, 1.0, %v1195_v50 }
 0x12a   : > { %v888_v51 = vadd.f32 %v887_v22, %v857_v43  ;;  %v820_v5 = vadd.f32 %v819_v48, %v789_v44  ;;  %v670_v2 = vadd.s32 %v1284_v27, %v637_v21  ;;  %v861_v33 = vmul.f32 %v792_v54, %v792_v54 }
 0x12b   : > { %v793_v3 = vmul.f32 %v1057_v61, %v1480_v38  ;;  %v1060_v57 = vsel %vm700_vm12, 1.0, %v1195_v50  ;;  %v671_v7 = vadd.s32 %v1284_v27, %v638_v62  ;;  %v794_v17 = vmul.f32 %v1058_v0, %v1443_v19 }
 0x12c   : > { %v821_v49 = vadd.f32 %v820_v5, %v790_v47  ;;  %v889_v55 = vadd.f32 %v888_v51, %v858_v6  ;;  %vm701_vm13 = vcmp.lt.s32.totalorder %v669_v39, 512  ;;  %v795_v10 = vmul.f32 %v1059_v26, %v1477_v29 }
 0x12d   : > { %vm702_vm14 = vcmp.lt.s32.totalorder %v670_v2, 512  ;;  %v862_v14 = vmul.f32 %v793_v3, %v793_v3  ;;  %v796_v15 = vmul.f32 %v1060_v57, %v1495_v12  ;;  %v1061_v16 = vsel %vm701_vm13, 1.0, %v1195_v50 }
 0x12e   : > { %v890_v23 = vadd.f32 %v889_v55, %v859_v63  ;;  %v822_v60 = vadd.f32 %v821_v49, %v791_v58  ;;  %v863_v38 = vmul.f32 %v794_v17, %v794_v17  ;;  %vm703_vm15 = vcmp.lt.s32.totalorder %v671_v7, 512 }
 0x12f   : > { %v864_v27 = vmul.f32 %v795_v10, %v795_v10  ;;  %v1062_v19 = vsel %vm702_vm14, 1.0, %v1195_v50  ;;  %v865_v30 = vmul.f32 %v796_v15, %v796_v15  ;;  %v797_v29 = vmul.f32 %v1061_v16, %v1521_v59 }
 0x130   : > { %v823_v8 = vadd.f32 %v822_v60, %v792_v54  ;;  %v891_v9 = vadd.f32 %v890_v23, %v860_v53  ;;  %v1063_v31 = vsel %vm703_vm15, 1.0, %v1195_v50  ;;  %v798_v11 = vmul.f32 %v1062_v19, %v1491_v4 }
 0x131   : > { %v799_v35 = vmul.f32 %v1063_v31, %v1518_v28  ;;  %v866_v37 = vmul.f32 %v797_v29, %v797_v29  ;;  %vm906_vm0 = vcmp.lt.s32.totalorder %v1280_v25, 4 }
 0x132   : > { %v892_v41 = vadd.f32 %v891_v9, %v861_v33  ;;  %v824_v13 = vadd.f32 %v823_v8, %v793_v3  ;;  %v867_v45 = vmul.f32 %v798_v11, %v798_v11 }
 0x133   : > { %v868_v43 = vmul.f32 %v799_v35, %v799_v35 }
 0x134   : > { %v825_v18 = vadd.f32 %v824_v13, %v794_v17  ;;  %v893_v20 = vadd.f32 %v892_v41, %v862_v14 }
 0x136   : > { %v894_v24 = vadd.f32 %v893_v20, %v863_v38  ;;  %v826_v1 = vadd.f32 %v825_v18, %v795_v10 }
 0x138   : > { %v827_v12 = vadd.f32 %v826_v1, %v796_v15  ;;  %v895_v32 = vadd.f32 %v894_v24, %v864_v27 }
 0x13a   : > { %v896_v34 = vadd.f32 %v895_v32, %v865_v30  ;;  %v828_v36 = vadd.f32 %v827_v12, %v797_v29 }
 0x13c   : > { %v829_v40 = vadd.f32 %v828_v36, %v798_v11  ;;  %v897_v42 = vadd.f32 %v896_v34, %v866_v37 }
 0x13e   : > { %v830_v44 = vadd.f32 %v829_v40, %v799_v35  ;;  %v898_v52 = vadd.f32 %v897_v42, %v867_v45 }
 0x140   : > { %v831_v59 = vrot.slane %v830_v44, 4  ;;  %v899_v46 = vadd.f32 %v898_v52, %v868_v43 }
 0x142   : > { %v832_v50 = vadd.f32 %v831_v59, %v830_v44  ;;  %v900_v47 = vrot.slane %v899_v46, 4 }
 0x144   : > { %v833_v4 = vrot.slane %v832_v50, 2  ;;  %v901_v48 = vadd.f32 %v900_v47, %v899_v46 }
 0x146   : > { %v834_v22 = vadd.f32 %v833_v4, %v832_v50  ;;  %v902_v56 = vrot.slane %v901_v48, 2 }
 0x148   : > { %v835_v28 = vrot.slane %v834_v22, 1  ;;  %v903_v58 = vadd.f32 %v902_v56, %v901_v48 }
 0x14a   : > { %v904_v21 = vrot.slane %v903_v58, 1  ;;  %v836_v51 = vadd.f32 %v835_v28, %v834_v22 }
 0x14c   : > { %v905_v5 = vadd.f32 %v904_v21, %v903_v58 }
 0x14e   : > { %v907_v6 = vsel %vm906_vm0, %v836_v51, %v905_v5 }
 0x14f   : > { %908 = vst [vmem:[%s211_s24] sm:$0xff] %v907_v6 }
 0x150 PF: > { %s15_s15 = sadd.s32 1, %s1193_s15  }
 0x151   : > { %p12_p5 = scmp.ge.s32.totalorder %s15_s15, 4  }
 0x153   :  { %14 = sbr.rel (!%p12_p5) target bundleno = 1 (0x1), region = 74 }

// kernel: basic_block_vcl_forward.9
= control target key start
LH: loop header
LB: loop body
LE: loop exit
PB: predicated region body
PF: predicated region fallthrough
CT: control target
= control target key end

     0   :  { %s729_s21 = smov 0   ;;  %s1004_s0 = inlined_call_operand.vmem [shape: f32[512,128], index: 0, kind: input, shape index: {}]   ;;  %s1005_s1 = inlined_call_operand.vmem [shape: f32[1,128], index: 1, kind: input, shape index: {}]   ;;  %s1006_s2 = inlined_call_operand.vmem [shape: f32[1,128], index: 2, kind: input, shape index: {}]   ;;  %s1007_s3 = inlined_call_operand.vmem [shape: f32[512,128], index: 3, kind: input, shape index: {}]   ;;  %s1008_s4 = inlined_call_operand.vmem [shape: f32[1,128], index: 4, kind: input, shape index: {}]   ;;  %s1009_s5 = inlined_call_operand.vmem [shape: f32[1,128], index: 5, kind: input, shape index: {}]   ;;  %s1010_s6 = inlined_call_operand.vmem [shape: f32[512,128], index: 6, kind: output, shape index: {}]  }
   0x1 LB: > { %s661_s22 = sadd.s32 4294967295, %s692_s21   ;;  %p665_p0 = scmp.ge.s32.totalorder %s692_s21, 1  ;;  %s692_s21 = sphi %s729_s21, %s16_s21  }
   0x2   : > { %p224_p1 = scmp.lt.s32.totalorder %s692_s21, 3 }
   0x4   : > { %p225_p2 = pnand %p665_p0, %p224_p1 }
   0x5   : > { %s666_s23 = sshll.u32 (!%p225_p2), %s661_s22, 5  ;;  %v742_v0 = vld [vmem:[%s1005_s1] ss:$0 sm:$0xff] (!%p225_p2) }
   0x6   : > { %228 = sbr.rel (%p225_p2) target bundleno = 72 (0x48), region = 44  ;;  %p260_p3 = scmp.lt.s32.totalorder (!%p225_p2), %s666_s23, 63  ;;  %v747_v1 = vld [vmem:[%s1008_s4] ss:$0 sm:$0xff] (!%p225_p2) }
   0x7   : > { %v764_v2 = vld [vmem:[%s1006_s2] ss:$0 sm:$0xff] (!%p225_p2) }
   0x8   : > { %v791_v25 = vld [vmem:[%s1009_s5] ss:$0 sm:$0xff] (!%p225_p2) }
   0xd   : > { %s1012_s23 = smov (!%p260_p3, %s666_s23), 63 }
   0xe   : > { %s737_s24 = sshll.u32 %s1012_s23, 3 }
   0xf   : > { %s753_s7 = scalar_lea.vmem %s1004_s0, %s737_s24  ;;  %s759_s10 = scalar_lea.vmem %s1007_s3, %s737_s24 }
  0x10   : > { %v277_v3 = vld [vmem:[%s753_s7] sm:$0xff]  ;;  %v278_v5 = vld [vmem:[%s753_s7 + $0x8] sm:$0xff]  ;;  %v279_v10 = vld [vmem:[%s753_s7 + $0x10] sm:$0xff]  ;;  %s812_s17 = scalar_lea.vmem %s1010_s6, %s737_s24 }
  0x11   : > { %v387_v4 = vld [vmem:[%s759_s10] sm:$0xff]  ;;  %v316_v6 = vmul.f32 %v742_v0, %v277_v3  ;;  %v317_v8 = vmul.f32 %v742_v0, %v278_v5  ;;  %v388_v9 = vld [vmem:[%s759_s10 + $0x8] sm:$0xff]  ;;  %v389_v11 = vld [vmem:[%s759_s10 + $0x10] sm:$0xff]  ;;  %v318_v13 = vmul.f32 %v742_v0, %v279_v10 }
  0x12   : > { %v426_v7 = vmul.f32 %v747_v1, %v387_v4  ;;  %v427_v12 = vmul.f32 %v747_v1, %v388_v9  ;;  %v428_v14 = vmul.f32 %v747_v1, %v389_v11  ;;  %v280_v15 = vld [vmem:[%s753_s7 + $0x18] sm:$0xff]  ;;  %v281_v17 = vld [vmem:[%s753_s7 + $0x20] sm:$0xff]  ;;  %v282_v23 = vld [vmem:[%s753_s7 + $0x28] sm:$0xff] }
  0x13   : > { %v390_v16 = vld [vmem:[%s759_s10 + $0x18] sm:$0xff]  ;;  %v355_v18 = vadd.f32 %v764_v2, %v316_v6  ;;  %v356_v19 = vadd.f32 %v764_v2, %v317_v8  ;;  %v319_v20 = vmul.f32 %v742_v0, %v280_v15  ;;  %v391_v22 = vld [vmem:[%s759_s10 + $0x20] sm:$0xff]  ;;  %v392_v24 = vld [vmem:[%s759_s10 + $0x28] sm:$0xff]  ;;  %v357_v26 = vadd.f32 %v764_v2, %v318_v13 }
  0x14   : > { %v429_v21 = vmul.f32 %v747_v1, %v390_v16  ;;  %v320_v27 = vmul.f32 %v742_v0, %v281_v17  ;;  %v430_v28 = vmul.f32 %v747_v1, %v391_v22  ;;  %v321_v29 = vmul.f32 %v742_v0, %v282_v23  ;;  %v283_v30 = vld [vmem:[%s753_s7 + $0x30] sm:$0xff]  ;;  %v284_v40 = vld [vmem:[%s753_s7 + $0x38] sm:$0xff]  ;;  %v285_v50 = vld [vmem:[%s753_s7 + $0x40] sm:$0xff] }
  0x15   : > { %v393_v31 = vld [vmem:[%s759_s10 + $0x30] sm:$0xff]  ;;  %v458_v32 = vadd.f32 %v426_v7, %v355_v18  ;;  %v459_v33 = vadd.f32 %v427_v12, %v356_v19  ;;  %v358_v34 = vadd.f32 %v764_v2, %v319_v20  ;;  %v431_v35 = vmul.f32 %v747_v1, %v392_v24  ;;  %v394_v49 = vld [vmem:[%s759_s10 + $0x38] sm:$0xff]  ;;  %v395_v55 = vld [vmem:[%s759_s10 + $0x40] sm:$0xff] }
  0x16   : > { %v460_v36 = vadd.f32 %v428_v14, %v357_v26  ;;  %v359_v37 = vadd.f32 %v764_v2, %v320_v27  ;;  %v360_v38 = vadd.f32 %v764_v2, %v321_v29  ;;  %v322_v39 = vmul.f32 %v742_v0, %v283_v30  ;;  %v286_v60 = vld [vmem:[%s753_s7 + $0x48] sm:$0xff]  ;;  %v287_v5 = vld [vmem:[%s753_s7 + $0x50] sm:$0xff]  ;;  %v288_v7 = vld [vmem:[%s753_s7 + $0x58] sm:$0xff] }
  0x17   : > { %v497_v41 = vadd.f32 %v791_v25, %v458_v32  ;;  %v498_v42 = vadd.f32 %v791_v25, %v459_v33  ;;  %v461_v43 = vadd.f32 %v429_v21, %v358_v34  ;;  %v432_v44 = vmul.f32 %v747_v1, %v393_v31  ;;  %v396_v61 = vld [vmem:[%s759_s10 + $0x48] sm:$0xff]  ;;  %v397_v6 = vld [vmem:[%s759_s10 + $0x50] sm:$0xff]  ;;  %v398_v12 = vld [vmem:[%s759_s10 + $0x58] sm:$0xff] }
  0x18   : > { %v499_v45 = vadd.f32 %v791_v25, %v460_v36  ;;  %v462_v46 = vadd.f32 %v430_v28, %v359_v37  ;;  %v463_v47 = vadd.f32 %v431_v35, %v360_v38  ;;  %v361_v48 = vadd.f32 %v764_v2, %v322_v39  ;;  %v289_v17 = vld [vmem:[%s753_s7 + $0x60] sm:$0xff]  ;;  %v290_v23 = vld [vmem:[%s753_s7 + $0x68] sm:$0xff]  ;;  %v291_v34 = vld [vmem:[%s753_s7 + $0x70] sm:$0xff] }
  0x19   : > { %v529_v51 = vmax.f32 %v497_v41, 0.0  ;;  %v530_v52 = vmax.f32 %v498_v42, 0.0  ;;  %v500_v53 = vadd.f32 %v791_v25, %v461_v43  ;;  %v323_v54 = vmul.f32 %v742_v0, %v284_v40  ;;  %v399_v18 = vld [vmem:[%s759_s10 + $0x60] sm:$0xff]  ;;  %v400_v29 = vld [vmem:[%s759_s10 + $0x68] sm:$0xff]  ;;  %v401_v39 = vld [vmem:[%s759_s10 + $0x70] sm:$0xff] }
  0x1a   : > { %v531_v56 = vmax.f32 %v499_v45, 0.0  ;;  %v501_v57 = vadd.f32 %v791_v25, %v462_v46  ;;  %v502_v58 = vadd.f32 %v791_v25, %v463_v47  ;;  %v464_v59 = vadd.f32 %v432_v44, %v361_v48  ;;  %v292_v44 = vld [vmem:[%s753_s7 + $0x78] sm:$0xff] }
  0x1b   : > { %561 = vst [vmem:[%s812_s17] sm:$0xff] %v529_v51  ;;  %562 = vst [vmem:[%s812_s17 + $0x8] sm:$0xff] %v530_v52  ;;  %v532_v62 = vmax.f32 %v500_v53, 0.0  ;;  %v362_v63 = vadd.f32 %v764_v2, %v323_v54  ;;  %v433_v3 = vmul.f32 %v747_v1, %v394_v49  ;;  %v324_v4 = vmul.f32 %v742_v0, %v285_v50  ;;  %v402_v49 = vld [vmem:[%s759_s10 + $0x78] sm:$0xff]  ;;  %v293_v54 = vld [vmem:[%s753_s7 + $0x80] sm:$0xff] }
  0x1c   : > { %563 = vst [vmem:[%s812_s17 + $0x10] sm:$0xff] %v531_v56  ;;  %v533_v8 = vmax.f32 %v501_v57, 0.0  ;;  %v534_v9 = vmax.f32 %v502_v58, 0.0  ;;  %v503_v10 = vadd.f32 %v791_v25, %v464_v59  ;;  %v434_v11 = vmul.f32 %v747_v1, %v395_v55  ;;  %v403_v59 = vld [vmem:[%s759_s10 + $0x80] sm:$0xff] }
  0x1d   : > { %564 = vst [vmem:[%s812_s17 + $0x18] sm:$0xff] %v532_v62  ;;  %v465_v13 = vadd.f32 %v433_v3, %v362_v63  ;;  %v363_v14 = vadd.f32 %v764_v2, %v324_v4  ;;  %v325_v15 = vmul.f32 %v742_v0, %v286_v60  ;;  %v435_v16 = vmul.f32 %v747_v1, %v396_v61  ;;  %v294_v60 = vld [vmem:[%s753_s7 + $0x88] sm:$0xff] }
  0x1e   : > { %565 = vst [vmem:[%s812_s17 + $0x20] sm:$0xff] %v533_v8  ;;  %566 = vst [vmem:[%s812_s17 + $0x28] sm:$0xff] %v534_v9  ;;  %v535_v19 = vmax.f32 %v503_v10, 0.0  ;;  %v326_v20 = vmul.f32 %v742_v0, %v287_v5  ;;  %v436_v21 = vmul.f32 %v747_v1, %v397_v6  ;;  %v327_v22 = vmul.f32 %v742_v0, %v288_v7  ;;  %v404_v61 = vld [vmem:[%s759_s10 + $0x88] sm:$0xff]  ;;  %v295_v9 = vld [vmem:[%s753_s7 + $0x90] sm:$0xff] }
  0x1f   : > { %v504_v24 = vadd.f32 %v791_v25, %v465_v13  ;;  %v466_v26 = vadd.f32 %v434_v11, %v363_v14  ;;  %v364_v27 = vadd.f32 %v764_v2, %v325_v15  ;;  %v437_v28 = vmul.f32 %v747_v1, %v398_v12  ;;  %v405_v10 = vld [vmem:[%s759_s10 + $0x90] sm:$0xff]  ;;  %v296_v11 = vld [vmem:[%s753_s7 + $0x98] sm:$0xff] }
  0x20   : > { %567 = vst [vmem:[%s812_s17 + $0x30] sm:$0xff] %v535_v19  ;;  %v365_v30 = vadd.f32 %v764_v2, %v326_v20  ;;  %v366_v31 = vadd.f32 %v764_v2, %v327_v22  ;;  %v328_v32 = vmul.f32 %v742_v0, %v289_v17  ;;  %v438_v33 = vmul.f32 %v747_v1, %v399_v18 }
  0x21   : > { %v536_v35 = vmax.f32 %v504_v24, 0.0  ;;  %v505_v36 = vadd.f32 %v791_v25, %v466_v26  ;;  %v467_v37 = vadd.f32 %v435_v16, %v364_v27  ;;  %v329_v38 = vmul.f32 %v742_v0, %v290_v23  ;;  %v406_v16 = vld [vmem:[%s759_s10 + $0x98] sm:$0xff]  ;;  %v407_v27 = vld [vmem:[%s759_s10 + $0xa0] sm:$0xff] }
  0x22   : > { %v468_v40 = vadd.f32 %v436_v21, %v365_v30  ;;  %v469_v41 = vadd.f32 %v437_v28, %v366_v31  ;;  %v367_v42 = vadd.f32 %v764_v2, %v328_v32  ;;  %v439_v43 = vmul.f32 %v747_v1, %v400_v29  ;;  %v297_v21 = vld [vmem:[%s753_s7 + $0xa0] sm:$0xff]  ;;  %v298_v28 = vld [vmem:[%s753_s7 + $0xa8] sm:$0xff] }
  0x23   : > { %568 = vst [vmem:[%s812_s17 + $0x38] sm:$0xff] %v536_v35  ;;  %v537_v45 = vmax.f32 %v505_v36, 0.0  ;;  %v506_v46 = vadd.f32 %v791_v25, %v467_v37  ;;  %v368_v47 = vadd.f32 %v764_v2, %v329_v38  ;;  %v330_v48 = vmul.f32 %v742_v0, %v291_v34  ;;  %v408_v37 = vld [vmem:[%s759_s10 + $0xa8] sm:$0xff]  ;;  %v299_v38 = vld [vmem:[%s753_s7 + $0xb0] sm:$0xff] }
  0x24   : > { %v507_v50 = vadd.f32 %v791_v25, %v468_v40  ;;  %v508_v51 = vadd.f32 %v791_v25, %v469_v41  ;;  %v470_v52 = vadd.f32 %v438_v33, %v367_v42  ;;  %v440_v53 = vmul.f32 %v747_v1, %v401_v39 }
  0x25   : > { %569 = vst [vmem:[%s812_s17 + $0x40] sm:$0xff] %v537_v45  ;;  %v538_v55 = vmax.f32 %v506_v46, 0.0  ;;  %v471_v56 = vadd.f32 %v439_v43, %v368_v47  ;;  %v369_v57 = vadd.f32 %v764_v2, %v330_v48  ;;  %v331_v58 = vmul.f32 %v742_v0, %v292_v44  ;;  %v409_v47 = vld [vmem:[%s759_s10 + $0xb0] sm:$0xff]  ;;  %v300_v48 = vld [vmem:[%s753_s7 + $0xb8] sm:$0xff] }
  0x26   : > { %v539_v62 = vmax.f32 %v507_v50, 0.0  ;;  %v540_v63 = vmax.f32 %v508_v51, 0.0  ;;  %v509_v3 = vadd.f32 %v791_v25, %v470_v52  ;;  %v441_v4 = vmul.f32 %v747_v1, %v402_v49 }
  0x27   : > { %570 = vst [vmem:[%s812_s17 + $0x48] sm:$0xff] %v538_v55  ;;  %v510_v5 = vadd.f32 %v791_v25, %v471_v56  ;;  %v472_v6 = vadd.f32 %v440_v53, %v369_v57  ;;  %v370_v7 = vadd.f32 %v764_v2, %v331_v58  ;;  %v332_v8 = vmul.f32 %v742_v0, %v293_v54  ;;  %v410_v53 = vld [vmem:[%s759_s10 + $0xb8] sm:$0xff]  ;;  %v301_v58 = vld [vmem:[%s753_s7 + $0xc0] sm:$0xff] }
  0x28   : > { %571 = vst [vmem:[%s812_s17 + $0x50] sm:$0xff] %v539_v62  ;;  %572 = vst [vmem:[%s812_s17 + $0x58] sm:$0xff] %v540_v63  ;;  %v541_v12 = vmax.f32 %v509_v3, 0.0  ;;  %v442_v13 = vmul.f32 %v747_v1, %v403_v59  ;;  %v333_v14 = vmul.f32 %v742_v0, %v294_v60  ;;  %v443_v15 = vmul.f32 %v747_v1, %v404_v61  ;;  %v411_v63 = vld [vmem:[%s759_s10 + $0xc0] sm:$0xff]  ;;  %v302_v3 = vld [vmem:[%s753_s7 + $0xc8] sm:$0xff] }
  0x29   : > { %v542_v17 = vmax.f32 %v510_v5, 0.0  ;;  %v511_v18 = vadd.f32 %v791_v25, %v472_v6  ;;  %v473_v19 = vadd.f32 %v441_v4, %v370_v7  ;;  %v371_v20 = vadd.f32 %v764_v2, %v332_v8  ;;  %v412_v4 = vld [vmem:[%s759_s10 + $0xc8] sm:$0xff] }
  0x2a   : > { %573 = vst [vmem:[%s812_s17 + $0x60] sm:$0xff] %v541_v12  ;;  %v372_v22 = vadd.f32 %v764_v2, %v333_v14  ;;  %v334_v23 = vmul.f32 %v742_v0, %v295_v9  ;;  %v444_v24 = vmul.f32 %v747_v1, %v405_v10  ;;  %v335_v26 = vmul.f32 %v742_v0, %v296_v11  ;;  %v413_v14 = vld [vmem:[%s759_s10 + $0xd0] sm:$0xff] }
  0x2b   : > { %574 = vst [vmem:[%s812_s17 + $0x68] sm:$0xff] %v542_v17  ;;  %v543_v29 = vmax.f32 %v511_v18, 0.0  ;;  %v512_v30 = vadd.f32 %v791_v25, %v473_v19  ;;  %v474_v31 = vadd.f32 %v442_v13, %v371_v20  ;;  %v445_v32 = vmul.f32 %v747_v1, %v406_v16  ;;  %v303_v13 = vld [vmem:[%s753_s7 + $0xd0] sm:$0xff]  ;;  %v414_v20 = vld [vmem:[%s759_s10 + $0xd8] sm:$0xff] }
  0x2c   : > { %v475_v33 = vadd.f32 %v443_v15, %v372_v22  ;;  %v373_v34 = vadd.f32 %v764_v2, %v334_v23  ;;  %v374_v35 = vadd.f32 %v764_v2, %v335_v26  ;;  %v336_v36 = vmul.f32 %v742_v0, %v297_v21  ;;  %v304_v15 = vld [vmem:[%s753_s7 + $0xd8] sm:$0xff]  ;;  %v305_v26 = vld [vmem:[%s753_s7 + $0xe0] sm:$0xff] }
  0x2d   : > { %575 = vst [vmem:[%s812_s17 + $0x70] sm:$0xff] %v543_v29  ;;  %v544_v39 = vmax.f32 %v512_v30, 0.0  ;;  %v513_v40 = vadd.f32 %v791_v25, %v474_v31  ;;  %v446_v41 = vmul.f32 %v747_v1, %v407_v27  ;;  %v337_v42 = vmul.f32 %v742_v0, %v298_v28  ;;  %v415_v31 = vld [vmem:[%s759_s10 + $0xe0] sm:$0xff] }
  0x2e   : > { %v514_v43 = vadd.f32 %v791_v25, %v475_v33  ;;  %v476_v44 = vadd.f32 %v444_v24, %v373_v34  ;;  %v477_v45 = vadd.f32 %v445_v32, %v374_v35  ;;  %v375_v46 = vadd.f32 %v764_v2, %v336_v36  ;;  %v306_v32 = vld [vmem:[%s753_s7 + $0xe8] sm:$0xff] }
  0x2f   : > { %576 = vst [vmem:[%s812_s17 + $0x78] sm:$0xff] %v544_v39  ;;  %v545_v49 = vmax.f32 %v513_v40, 0.0  ;;  %v376_v50 = vadd.f32 %v764_v2, %v337_v42  ;;  %v447_v51 = vmul.f32 %v747_v1, %v408_v37  ;;  %v338_v52 = vmul.f32 %v742_v0, %v299_v38  ;;  %v307_v42 = vld [vmem:[%s753_s7 + $0xf0] sm:$0xff] }
  0x30   : > { %v546_v54 = vmax.f32 %v514_v43, 0.0  ;;  %v515_v55 = vadd.f32 %v791_v25, %v476_v44  ;;  %v516_v56 = vadd.f32 %v791_v25, %v477_v45  ;;  %v478_v57 = vadd.f32 %v446_v41, %v375_v46  ;;  %v416_v41 = vld [vmem:[%s759_s10 + $0xe8] sm:$0xff] }
  0x31   : > { %577 = vst [vmem:[%s812_s17 + $0x80] sm:$0xff] %v545_v49  ;;  %v479_v59 = vadd.f32 %v447_v51, %v376_v50  ;;  %v377_v60 = vadd.f32 %v764_v2, %v338_v52  ;;  %v448_v61 = vmul.f32 %v747_v1, %v409_v47  ;;  %v339_v62 = vmul.f32 %v742_v0, %v300_v48  ;;  %v417_v51 = vld [vmem:[%s759_s10 + $0xf0] sm:$0xff]  ;;  %v308_v52 = vld [vmem:[%s753_s7 + $0xf8] sm:$0xff] }
  0x32   : > { %578 = vst [vmem:[%s812_s17 + $0x88] sm:$0xff] %v546_v54  ;;  %v547_v5 = vmax.f32 %v515_v55, 0.0  ;;  %v548_v6 = vmax.f32 %v516_v56, 0.0  ;;  %v517_v7 = vadd.f32 %v791_v25, %v478_v57  ;;  %v449_v8 = vmul.f32 %v747_v1, %v410_v53  ;;  %v418_v57 = vld [vmem:[%s759_s10 + $0xf8] sm:$0xff] }
  0x33   : > { %v518_v9 = vadd.f32 %v791_v25, %v479_v59  ;;  %v480_v10 = vadd.f32 %v448_v61, %v377_v60  ;;  %v378_v11 = vadd.f32 %v764_v2, %v339_v62  ;;  %v340_v12 = vmul.f32 %v742_v0, %v301_v58 }
  0x34   : > { %579 = vst [vmem:[%s812_s17 + $0x90] sm:$0xff] %v547_v5  ;;  %580 = vst [vmem:[%s812_s17 + $0x98] sm:$0xff] %v548_v6  ;;  %v549_v16 = vmax.f32 %v517_v7, 0.0  ;;  %v450_v17 = vmul.f32 %v747_v1, %v411_v63  ;;  %v341_v18 = vmul.f32 %v742_v0, %v302_v3  ;;  %v451_v19 = vmul.f32 %v747_v1, %v412_v4 }
  0x35   : > { %v550_v21 = vmax.f32 %v518_v9, 0.0  ;;  %v519_v22 = vadd.f32 %v791_v25, %v480_v10  ;;  %v481_v23 = vadd.f32 %v449_v8, %v378_v11  ;;  %v379_v24 = vadd.f32 %v764_v2, %v340_v12 }
  0x36   : > { %581 = vst [vmem:[%s812_s17 + $0xa0] sm:$0xff] %v549_v16  ;;  %v380_v27 = vadd.f32 %v764_v2, %v341_v18  ;;  %v342_v28 = vmul.f32 %v742_v0, %v303_v13  ;;  %v452_v29 = vmul.f32 %v747_v1, %v413_v14  ;;  %v343_v30 = vmul.f32 %v742_v0, %v304_v15 }
  0x37   : > { %582 = vst [vmem:[%s812_s17 + $0xa8] sm:$0xff] %v550_v21  ;;  %v551_v33 = vmax.f32 %v519_v22, 0.0  ;;  %v520_v34 = vadd.f32 %v791_v25, %v481_v23  ;;  %v482_v35 = vadd.f32 %v450_v17, %v379_v24  ;;  %v453_v36 = vmul.f32 %v747_v1, %v414_v20 }
  0x38   : > { %v483_v37 = vadd.f32 %v451_v19, %v380_v27  ;;  %v381_v38 = vadd.f32 %v764_v2, %v342_v28  ;;  %v382_v39 = vadd.f32 %v764_v2, %v343_v30  ;;  %v344_v40 = vmul.f32 %v742_v0, %v305_v26 }
  0x39   : > { %583 = vst [vmem:[%s812_s17 + $0xb0] sm:$0xff] %v551_v33  ;;  %v552_v43 = vmax.f32 %v520_v34, 0.0  ;;  %v521_v44 = vadd.f32 %v791_v25, %v482_v35  ;;  %v454_v45 = vmul.f32 %v747_v1, %v415_v31  ;;  %v345_v46 = vmul.f32 %v742_v0, %v306_v32 }
  0x3a   : > { %v522_v47 = vadd.f32 %v791_v25, %v483_v37  ;;  %v484_v48 = vadd.f32 %v452_v29, %v381_v38  ;;  %v485_v49 = vadd.f32 %v453_v36, %v382_v39  ;;  %v383_v50 = vadd.f32 %v764_v2, %v344_v40 }
  0x3b   : > { %584 = vst [vmem:[%s812_s17 + $0xb8] sm:$0xff] %v552_v43  ;;  %v553_v53 = vmax.f32 %v521_v44, 0.0  ;;  %v384_v54 = vadd.f32 %v764_v2, %v345_v46  ;;  %v455_v55 = vmul.f32 %v747_v1, %v416_v41  ;;  %v346_v56 = vmul.f32 %v742_v0, %v307_v42 }
  0x3c   : > { %v554_v58 = vmax.f32 %v522_v47, 0.0  ;;  %v523_v59 = vadd.f32 %v791_v25, %v484_v48  ;;  %v524_v60 = vadd.f32 %v791_v25, %v485_v49  ;;  %v486_v61 = vadd.f32 %v454_v45, %v383_v50 }
  0x3d   : > { %585 = vst [vmem:[%s812_s17 + $0xc0] sm:$0xff] %v553_v53  ;;  %v487_v62 = vadd.f32 %v455_v55, %v384_v54  ;;  %v385_v63 = vadd.f32 %v764_v2, %v346_v56  ;;  %v456_v3 = vmul.f32 %v747_v1, %v417_v51  ;;  %v347_v4 = vmul.f32 %v742_v0, %v308_v52 }
  0x3e   : > { %586 = vst [vmem:[%s812_s17 + $0xc8] sm:$0xff] %v554_v58  ;;  %v555_v5 = vmax.f32 %v523_v59, 0.0  ;;  %v556_v6 = vmax.f32 %v524_v60, 0.0  ;;  %v525_v7 = vadd.f32 %v791_v25, %v486_v61  ;;  %v457_v8 = vmul.f32 %v747_v1, %v418_v57 }
  0x3f   : > { %v526_v9 = vadd.f32 %v791_v25, %v487_v62  ;;  %v488_v10 = vadd.f32 %v456_v3, %v385_v63  ;;  %v386_v11 = vadd.f32 %v764_v2, %v347_v4 }
  0x40   : > { %587 = vst [vmem:[%s812_s17 + $0xd0] sm:$0xff] %v555_v5  ;;  %588 = vst [vmem:[%s812_s17 + $0xd8] sm:$0xff] %v556_v6  ;;  %v557_v12 = vmax.f32 %v525_v7, 0.0 }
  0x41   : > { %v558_v13 = vmax.f32 %v526_v9, 0.0  ;;  %v527_v0 = vadd.f32 %v791_v25, %v488_v10  ;;  %v489_v14 = vadd.f32 %v457_v8, %v386_v11 }
  0x42   : > { %589 = vst [vmem:[%s812_s17 + $0xe0] sm:$0xff] %v557_v12 }
  0x43   : > { %590 = vst [vmem:[%s812_s17 + $0xe8] sm:$0xff] %v558_v13  ;;  %v559_v15 = vmax.f32 %v527_v0, 0.0  ;;  %v528_v16 = vadd.f32 %v791_v25, %v489_v14 }
  0x45   : > { %591 = vst [vmem:[%s812_s17 + $0xf0] sm:$0xff] %v559_v15  ;;  %v560_v1 = vmax.f32 %v528_v16, 0.0 }
  0x47   : > { %592 = vst [vmem:[%s812_s17 + $0xf8] sm:$0xff] %v560_v1 }
  0x48 PF: > { %s16_s21 = sadd.s32 1, %s692_s21  }
  0x49   : > { %p13_p4 = scmp.ge.s32.totalorder %s16_s21, 4  }
  0x4b   :  { %15 = sbr.rel (!%p13_p4) target bundleno = 1 (0x1), region = 77 }

</bundles_post_ra>
